<compile_context>
chip_gen: v6e
topology: v6e:2x2x1
jax: 0.10.0
libtpu: 0.0.40
codegen_flags: <defaults>
</compile_context>

<pallas_src>
import functools
import math

import jax
import jax.numpy as jnp
from jax.experimental import pallas as pl
from jax.experimental.pallas import tpu as pltpu


def _gelu(x):
    # Exact GELU (PyTorch nn.GELU default): 0.5 * x * (1 + erf(x / sqrt(2)))
    return 0.5 * x * (1.0 + jax.lax.erf(x * (1.0 / math.sqrt(2.0))))


def _ensemble_kernel(x_ref, w0_ref, b0_ref, wh_ref, bh_ref, w2_ref, b2_ref,
                     out_ref, *, n_models, n_ensembles, hidden_dim,
                     num_hidden_layers):
    # x_ref:  (B, x_dim)
    # w0_ref: (x_dim, n_models*H)        b0_ref: (1, n_models*H)
    # wh_ref: (n_models, L, H, H)        bh_ref: (n_models, L, 1, H)
    # w2_ref: (n_models, 1, H)           b2_ref: (n_models, 1, 1)
    # out_ref:(B, 1 + n_constraints)  -- col 0 = ensemble mean, cols 1.. = constraints
    H = hidden_dim
    x = x_ref[...]

    # Fused layer 0 across all models: one wide MXU matmul + one wide GELU.
    h0 = jnp.dot(x, w0_ref[...], preferred_element_type=jnp.float32) + b0_ref[...]
    h0 = _gelu(h0)                                       # (B, n_models*H)

    cols = []
    for m in range(n_models):                            # static unroll
        h = h0[:, m * H:(m + 1) * H]                     # lane-tile-aligned slice
        for l in range(num_hidden_layers):               # static unroll
            h = jnp.dot(h, wh_ref[m, l],
                        preferred_element_type=jnp.float32) + bh_ref[m, l]
            h = _gelu(h)
        # Output projection as VPU multiply + lane reduction (avoids an N=1
        # MXU matmul and the padded (H,1) weight layout).
        col = jnp.sum(h * w2_ref[m], axis=-1, keepdims=True) + b2_ref[m]  # (B,1)
        cols.append(col)

    # Fused ensemble mean over the first n_ensembles proxies.
    mean = sum(cols[:n_ensembles]) * (1.0 / n_ensembles)                  # (B,1)
    parts = [mean] + cols[n_ensembles:]
    out = parts[0] if len(parts) == 1 else jnp.concatenate(parts, axis=-1)
    out_ref[...] = out.astype(out_ref.dtype)


def pack_params(params):
    """Convert per-model (PyTorch-like) params to the fused kernel layout.

    Intended to be done once (outside the hot path)."""
    w0, b0, wh, bh, w2, b2 = params
    n_models, x_dim, H = w0.shape
    L = wh.shape[1]
    w0p = jnp.transpose(w0, (1, 0, 2)).reshape(x_dim, n_models * H)
    b0p = b0.reshape(1, n_models * H)
    bhp = bh.reshape(n_models, L, 1, H)
    w2p = jnp.transpose(w2, (0, 2, 1))                   # (n_models, 1, H)
    b2p = b2.reshape(n_models, 1, 1)
    return (w0p, b0p, wh, bhp, w2p, b2p)


def proxy_ensemble_forward(x, packed_params, n_ensembles):
    """Returns (mean over ensemble [B,1], stacked constraint outputs [C,B,1])."""
    w0p, b0p, wh, bhp, w2p, b2p = packed_params
    B, x_dim = x.shape
    n_models, L, H, _ = wh.shape
    n_constraints = n_models - n_ensembles

    # All weights live in VMEM for the single grid step (~580 KB at these
    # shapes, fine on v5e/v6e/v7x).
    # TODO(synk): re-introduce a grid over (model, layer) if hidden_dim /
    # num_hidden_layers grow such that 2*L*H*H*4 bytes exceeds a few MiB.

    kernel = functools.partial(
        _ensemble_kernel, n_models=n_models, n_ensembles=n_ensembles,
        hidden_dim=H, num_hidden_layers=L)

    out = pl.pallas_call(
        kernel,
        out_shape=jax.ShapeDtypeStruct((B, 1 + n_constraints), jnp.float32),
        grid_spec=pltpu.PrefetchScalarGridSpec(
            num_scalar_prefetch=0,
            grid=(1,),
            in_specs=[
                pl.BlockSpec((B, x_dim), lambda i: (0, 0)),
                pl.BlockSpec((x_dim, n_models * H), lambda i: (0, 0)),
                pl.BlockSpec((1, n_models * H), lambda i: (0, 0)),
                pl.BlockSpec((n_models, L, H, H), lambda i: (0, 0, 0, 0)),
                pl.BlockSpec((n_models, L, 1, H), lambda i: (0, 0, 0, 0)),
                pl.BlockSpec((n_models, 1, H), lambda i: (0, 0, 0)),
                pl.BlockSpec((n_models, 1, 1), lambda i: (0, 0, 0)),
            ],
            out_specs=pl.BlockSpec((B, 1 + n_constraints), lambda i: (0, 0)),
        ),
        compiler_params=pltpu.CompilerParams(
            dimension_semantics=("arbitrary",)),
    )(x, w0p, b0p, wh, bhp, w2p, b2p)

    mean = out[:, :1]                                     # (B, 1)
    constraints = jnp.transpose(out[:, 1:])[:, :, None]   # (C, B, 1)
    return mean, constraints


def init_params(key, x_dim, hidden_dim, num_hidden_layers, n_models):
    """Deterministic PyTorch-Linear-style init: U(-1/sqrt(fan_in), 1/sqrt(fan_in))."""
    keys = jax.random.split(key, 6)

    def u(k, shape, fan_in):
        bound = 1.0 / math.sqrt(fan_in)
        return jax.random.uniform(k, shape, jnp.float32, -bound, bound)

    w0 = u(keys[0], (n_models, x_dim, hidden_dim), x_dim)
    b0 = u(keys[1], (n_models, hidden_dim), x_dim)
    wh = u(keys[2], (n_models, num_hidden_layers, hidden_dim, hidden_dim),
           hidden_dim)
    bh = u(keys[3], (n_models, num_hidden_layers, hidden_dim), hidden_dim)
    w2 = u(keys[4], (n_models, hidden_dim, 1), hidden_dim)
    b2 = u(keys[5], (n_models, 1), hidden_dim)
    return (w0, b0, wh, bh, w2, b2)


def reference_forward(x, params, n_ensembles):
    """Pure-JAX reference of ProxyEnsemble.forward (n_ensembles > 1 branch)."""
    w0, b0, wh, bh, w2, b2 = params

    def one(m):
        h = _gelu(x @ w0[m] + b0[m])
        for l in range(wh.shape[1]):
            h = _gelu(h @ wh[m, l] + bh[m, l])
        return h @ w2[m] + b2[m]

    outs = jnp.stack([one(m) for m in range(w0.shape[0])], axis=0)
    return jnp.mean(outs[:n_ensembles], axis=0), outs[n_ensembles:]


if __name__ == "__main__":
    # Small, module-consistent shapes:
    #   batch B=8, x_dim=32, hidden_dim=128, num_hidden_layers=1,
    #   n_ensembles=5, output_dim=3  ->  2 constraint proxies, 7 MLPs total.
    B, X_DIM, HIDDEN, L = 8, 32, 128, 1
    N_ENSEMBLES, OUTPUT_DIM = 5, 3
    N_MODELS = N_ENSEMBLES + (OUTPUT_DIM - 1)

    key = jax.random.PRNGKey(0)
    kx, kp = jax.random.split(key)
    x = jax.random.normal(kx, (B, X_DIM), dtype=jnp.float32)
    params = init_params(kp, X_DIM, HIDDEN, L, N_MODELS)
    packed = pack_params(params)

    mean, constraints = proxy_ensemble_forward(x, packed, N_ENSEMBLES)
    mean = jax.block_until_ready(mean)
    constraints = jax.block_until_ready(constraints)

    ref_mean, ref_constraints = reference_forward(x, params, N_ENSEMBLES)

    assert mean.shape == (B, 1)
    assert constraints.shape == (OUTPUT_DIM - 1, B, 1)
    assert jnp.allclose(mean, ref_mean, atol=1e-4, rtol=1e-4)
    assert jnp.allclose(constraints, ref_constraints, atol=1e-4, rtol=1e-4)

    print("KERNEL_OK")
</pallas_src>

<mosaic_0001>
module attributes {stable_mosaic.version = 11 : i64} {
  func.func @_ensemble_kernel(%arg0: i32, %arg1: memref<8x32xf32, #tpu.memory_space<vmem>>, %arg2: memref<32x896xf32, #tpu.memory_space<vmem>>, %arg3: memref<1x896xf32, #tpu.memory_space<vmem>>, %arg4: memref<7x1x128x128xf32, #tpu.memory_space<vmem>>, %arg5: memref<7x1x1x128xf32, #tpu.memory_space<vmem>>, %arg6: memref<7x1x128xf32, #tpu.memory_space<vmem>>, %arg7: memref<7x1x1xf32, #tpu.memory_space<vmem>>, %arg8: memref<8x3xf32, #tpu.memory_space<vmem>>) attributes {dimension_semantics = [#tpu.dimension_semantics<arbitrary>], iteration_bounds = array<i64: 1>, scalar_prefetch = 0 : i64, scratch_operands = 0 : i64, tpu.core_type = #tpu.core_type<tc>, window_params = [{pipeline_mode = #tpu.pipeline_mode<synchronous>, transform_indices = @transform_0, window_bounds = array<i64: 8, 32>}, {pipeline_mode = #tpu.pipeline_mode<synchronous>, transform_indices = @transform_1, window_bounds = array<i64: 32, 896>}, {pipeline_mode = #tpu.pipeline_mode<synchronous>, transform_indices = @transform_2, window_bounds = array<i64: 1, 896>}, {pipeline_mode = #tpu.pipeline_mode<synchronous>, transform_indices = @transform_3, window_bounds = array<i64: 7, 1, 128, 128>}, {pipeline_mode = #tpu.pipeline_mode<synchronous>, transform_indices = @transform_4, window_bounds = array<i64: 7, 1, 1, 128>}, {pipeline_mode = #tpu.pipeline_mode<synchronous>, transform_indices = @transform_5, window_bounds = array<i64: 7, 1, 128>}, {pipeline_mode = #tpu.pipeline_mode<synchronous>, transform_indices = @transform_6, window_bounds = array<i64: 7, 1, 1>}, {pipeline_mode = #tpu.pipeline_mode<synchronous>, transform_indices = @transform_7, window_bounds = array<i64: 8, 3>}]} {
    %c0 = arith.constant 0 : index
    %c0_0 = arith.constant 0 : index
    %0 = vector.load %arg1[%c0, %c0_0] : memref<8x32xf32, #tpu.memory_space<vmem>>, vector<8x32xf32>
    %c0_1 = arith.constant 0 : index
    %c0_2 = arith.constant 0 : index
    %1 = vector.load %arg2[%c0_1, %c0_2] : memref<32x896xf32, #tpu.memory_space<vmem>>, vector<32x896xf32>
    %cst = arith.constant dense<0.000000e+00> : vector<8x896xf32>
    %2 = tpu.matmul %0, %1, %cst {dimension_numbers = #tpu.dot_dimension_numbers<[1], [0], [0], [1], [0, 0, 1, 1], [], []>} : vector<8x32xf32>, vector<32x896xf32>, vector<8x896xf32> -> vector<8x896xf32>
    %c0_3 = arith.constant 0 : index
    %c0_4 = arith.constant 0 : index
    %3 = vector.load %arg3[%c0_3, %c0_4] : memref<1x896xf32, #tpu.memory_space<vmem>>, vector<1x896xf32>
    %4 = vector.broadcast %3 : vector<1x896xf32> to vector<8x896xf32>
    %5 = arith.addf %2, %4 : vector<8x896xf32>
    %cst_5 = arith.constant 5.000000e-01 : f32
    %6 = vector.broadcast %cst_5 : f32 to vector<8x896xf32>
    %7 = arith.mulf %6, %5 : vector<8x896xf32>
    %cst_6 = arith.constant 0.707106769 : f32
    %8 = vector.broadcast %cst_6 : f32 to vector<8x896xf32>
    %9 = arith.mulf %5, %8 : vector<8x896xf32>
    %10 = math.erf %9 : vector<8x896xf32>
    %cst_7 = arith.constant 1.000000e+00 : f32
    %11 = vector.broadcast %cst_7 : f32 to vector<8x896xf32>
    %12 = arith.addf %11, %10 : vector<8x896xf32>
    %13 = arith.mulf %7, %12 : vector<8x896xf32>
    %14 = vector.extract_strided_slice %13 {offsets = [0, 0], sizes = [8, 128], strides = [1, 1]} : vector<8x896xf32> to vector<8x128xf32>
    %c0_8 = arith.constant 0 : index
    %c0_9 = arith.constant 0 : index
    %c0_10 = arith.constant 0 : index
    %c0_11 = arith.constant 0 : index
    %15 = vector.load %arg4[%c0_8, %c0_9, %c0_10, %c0_11] : memref<7x1x128x128xf32, #tpu.memory_space<vmem>>, vector<1x1x128x128xf32>
    %16 = vector.shape_cast %15 : vector<1x1x128x128xf32> to vector<128x128xf32>
    %cst_12 = arith.constant dense<0.000000e+00> : vector<8x128xf32>
    %17 = tpu.matmul %14, %16, %cst_12 {dimension_numbers = #tpu.dot_dimension_numbers<[1], [0], [0], [1], [0, 0, 1, 1], [], []>} : vector<8x128xf32>, vector<128x128xf32>, vector<8x128xf32> -> vector<8x128xf32>
    %c0_13 = arith.constant 0 : index
    %c0_14 = arith.constant 0 : index
    %c0_15 = arith.constant 0 : index
    %c0_16 = arith.constant 0 : index
    %18 = vector.load %arg5[%c0_13, %c0_14, %c0_15, %c0_16] : memref<7x1x1x128xf32, #tpu.memory_space<vmem>>, vector<1x1x1x128xf32>
    %19 = vector.shape_cast %18 : vector<1x1x1x128xf32> to vector<1x128xf32>
    %20 = vector.broadcast %19 : vector<1x128xf32> to vector<8x128xf32>
    %21 = arith.addf %17, %20 : vector<8x128xf32>
    %cst_17 = arith.constant 5.000000e-01 : f32
    %22 = vector.broadcast %cst_17 : f32 to vector<8x128xf32>
    %23 = arith.mulf %22, %21 : vector<8x128xf32>
    %cst_18 = arith.constant 0.707106769 : f32
    %24 = vector.broadcast %cst_18 : f32 to vector<8x128xf32>
    %25 = arith.mulf %21, %24 : vector<8x128xf32>
    %26 = math.erf %25 : vector<8x128xf32>
    %cst_19 = arith.constant 1.000000e+00 : f32
    %27 = vector.broadcast %cst_19 : f32 to vector<8x128xf32>
    %28 = arith.addf %27, %26 : vector<8x128xf32>
    %29 = arith.mulf %23, %28 : vector<8x128xf32>
    %c0_20 = arith.constant 0 : index
    %c0_21 = arith.constant 0 : index
    %c0_22 = arith.constant 0 : index
    %30 = vector.load %arg6[%c0_20, %c0_21, %c0_22] : memref<7x1x128xf32, #tpu.memory_space<vmem>>, vector<1x1x128xf32>
    %31 = vector.shape_cast %30 : vector<1x1x128xf32> to vector<1x128xf32>
    %32 = vector.broadcast %31 : vector<1x128xf32> to vector<8x128xf32>
    %33 = arith.mulf %29, %32 : vector<8x128xf32>
    %cst_23 = arith.constant dense<0.000000e+00> : vector<8xf32>
    %34 = vector.multi_reduction <add>, %33, %cst_23 [1] : vector<8x128xf32> to vector<8xf32>
    %35 = vector.shape_cast %34 : vector<8xf32> to vector<8x1xf32>
    %c0_24 = arith.constant 0 : index
    %c0_25 = arith.constant 0 : index
    %c0_26 = arith.constant 0 : index
    %36 = vector.load %arg7[%c0_24, %c0_25, %c0_26] : memref<7x1x1xf32, #tpu.memory_space<vmem>>, vector<1x1x1xf32>
    %37 = vector.shape_cast %36 : vector<1x1x1xf32> to vector<1x1xf32>
    %38 = vector.broadcast %37 : vector<1x1xf32> to vector<8x1xf32>
    %39 = arith.addf %35, %38 : vector<8x1xf32>
    %40 = vector.extract_strided_slice %13 {offsets = [0, 128], sizes = [8, 128], strides = [1, 1]} : vector<8x896xf32> to vector<8x128xf32>
    %c1 = arith.constant 1 : index
    %c0_27 = arith.constant 0 : index
    %c0_28 = arith.constant 0 : index
    %c0_29 = arith.constant 0 : index
    %41 = vector.load %arg4[%c1, %c0_27, %c0_28, %c0_29] : memref<7x1x128x128xf32, #tpu.memory_space<vmem>>, vector<1x1x128x128xf32>
    %42 = vector.shape_cast %41 : vector<1x1x128x128xf32> to vector<128x128xf32>
    %cst_30 = arith.constant dense<0.000000e+00> : vector<8x128xf32>
    %43 = tpu.matmul %40, %42, %cst_30 {dimension_numbers = #tpu.dot_dimension_numbers<[1], [0], [0], [1], [0, 0, 1, 1], [], []>} : vector<8x128xf32>, vector<128x128xf32>, vector<8x128xf32> -> vector<8x128xf32>
    %c1_31 = arith.constant 1 : index
    %c0_32 = arith.constant 0 : index
    %c0_33 = arith.constant 0 : index
    %c0_34 = arith.constant 0 : index
    %44 = vector.load %arg5[%c1_31, %c0_32, %c0_33, %c0_34] : memref<7x1x1x128xf32, #tpu.memory_space<vmem>>, vector<1x1x1x128xf32>
    %45 = vector.shape_cast %44 : vector<1x1x1x128xf32> to vector<1x128xf32>
    %46 = vector.broadcast %45 : vector<1x128xf32> to vector<8x128xf32>
    %47 = arith.addf %43, %46 : vector<8x128xf32>
    %cst_35 = arith.constant 5.000000e-01 : f32
    %48 = vector.broadcast %cst_35 : f32 to vector<8x128xf32>
    %49 = arith.mulf %48, %47 : vector<8x128xf32>
    %cst_36 = arith.constant 0.707106769 : f32
    %50 = vector.broadcast %cst_36 : f32 to vector<8x128xf32>
    %51 = arith.mulf %47, %50 : vector<8x128xf32>
    %52 = math.erf %51 : vector<8x128xf32>
    %cst_37 = arith.constant 1.000000e+00 : f32
    %53 = vector.broadcast %cst_37 : f32 to vector<8x128xf32>
    %54 = arith.addf %53, %52 : vector<8x128xf32>
    %55 = arith.mulf %49, %54 : vector<8x128xf32>
    %c1_38 = arith.constant 1 : index
    %c0_39 = arith.constant 0 : index
    %c0_40 = arith.constant 0 : index
    %56 = vector.load %arg6[%c1_38, %c0_39, %c0_40] : memref<7x1x128xf32, #tpu.memory_space<vmem>>, vector<1x1x128xf32>
    %57 = vector.shape_cast %56 : vector<1x1x128xf32> to vector<1x128xf32>
    %58 = vector.broadcast %57 : vector<1x128xf32> to vector<8x128xf32>
    %59 = arith.mulf %55, %58 : vector<8x128xf32>
    %cst_41 = arith.constant dense<0.000000e+00> : vector<8xf32>
    %60 = vector.multi_reduction <add>, %59, %cst_41 [1] : vector<8x128xf32> to vector<8xf32>
    %61 = vector.shape_cast %60 : vector<8xf32> to vector<8x1xf32>
    %c1_42 = arith.constant 1 : index
    %c0_43 = arith.constant 0 : index
    %c0_44 = arith.constant 0 : index
    %62 = vector.load %arg7[%c1_42, %c0_43, %c0_44] : memref<7x1x1xf32, #tpu.memory_space<vmem>>, vector<1x1x1xf32>
    %63 = vector.shape_cast %62 : vector<1x1x1xf32> to vector<1x1xf32>
    %64 = vector.broadcast %63 : vector<1x1xf32> to vector<8x1xf32>
    %65 = arith.addf %61, %64 : vector<8x1xf32>
    %66 = vector.extract_strided_slice %13 {offsets = [0, 256], sizes = [8, 128], strides = [1, 1]} : vector<8x896xf32> to vector<8x128xf32>
    %c2 = arith.constant 2 : index
    %c0_45 = arith.constant 0 : index
    %c0_46 = arith.constant 0 : index
    %c0_47 = arith.constant 0 : index
    %67 = vector.load %arg4[%c2, %c0_45, %c0_46, %c0_47] : memref<7x1x128x128xf32, #tpu.memory_space<vmem>>, vector<1x1x128x128xf32>
    %68 = vector.shape_cast %67 : vector<1x1x128x128xf32> to vector<128x128xf32>
    %cst_48 = arith.constant dense<0.000000e+00> : vector<8x128xf32>
    %69 = tpu.matmul %66, %68, %cst_48 {dimension_numbers = #tpu.dot_dimension_numbers<[1], [0], [0], [1], [0, 0, 1, 1], [], []>} : vector<8x128xf32>, vector<128x128xf32>, vector<8x128xf32> -> vector<8x128xf32>
    %c2_49 = arith.constant 2 : index
    %c0_50 = arith.constant 0 : index
    %c0_51 = arith.constant 0 : index
    %c0_52 = arith.constant 0 : index
    %70 = vector.load %arg5[%c2_49, %c0_50, %c0_51, %c0_52] : memref<7x1x1x128xf32, #tpu.memory_space<vmem>>, vector<1x1x1x128xf32>
    %71 = vector.shape_cast %70 : vector<1x1x1x128xf32> to vector<1x128xf32>
    %72 = vector.broadcast %71 : vector<1x128xf32> to vector<8x128xf32>
    %73 = arith.addf %69, %72 : vector<8x128xf32>
    %cst_53 = arith.constant 5.000000e-01 : f32
    %74 = vector.broadcast %cst_53 : f32 to vector<8x128xf32>
    %75 = arith.mulf %74, %73 : vector<8x128xf32>
    %cst_54 = arith.constant 0.707106769 : f32
    %76 = vector.broadcast %cst_54 : f32 to vector<8x128xf32>
    %77 = arith.mulf %73, %76 : vector<8x128xf32>
    %78 = math.erf %77 : vector<8x128xf32>
    %cst_55 = arith.constant 1.000000e+00 : f32
    %79 = vector.broadcast %cst_55 : f32 to vector<8x128xf32>
    %80 = arith.addf %79, %78 : vector<8x128xf32>
    %81 = arith.mulf %75, %80 : vector<8x128xf32>
    %c2_56 = arith.constant 2 : index
    %c0_57 = arith.constant 0 : index
    %c0_58 = arith.constant 0 : index
    %82 = vector.load %arg6[%c2_56, %c0_57, %c0_58] : memref<7x1x128xf32, #tpu.memory_space<vmem>>, vector<1x1x128xf32>
    %83 = vector.shape_cast %82 : vector<1x1x128xf32> to vector<1x128xf32>
    %84 = vector.broadcast %83 : vector<1x128xf32> to vector<8x128xf32>
    %85 = arith.mulf %81, %84 : vector<8x128xf32>
    %cst_59 = arith.constant dense<0.000000e+00> : vector<8xf32>
    %86 = vector.multi_reduction <add>, %85, %cst_59 [1] : vector<8x128xf32> to vector<8xf32>
    %87 = vector.shape_cast %86 : vector<8xf32> to vector<8x1xf32>
    %c2_60 = arith.constant 2 : index
    %c0_61 = arith.constant 0 : index
    %c0_62 = arith.constant 0 : index
    %88 = vector.load %arg7[%c2_60, %c0_61, %c0_62] : memref<7x1x1xf32, #tpu.memory_space<vmem>>, vector<1x1x1xf32>
    %89 = vector.shape_cast %88 : vector<1x1x1xf32> to vector<1x1xf32>
    %90 = vector.broadcast %89 : vector<1x1xf32> to vector<8x1xf32>
    %91 = arith.addf %87, %90 : vector<8x1xf32>
    %92 = vector.extract_strided_slice %13 {offsets = [0, 384], sizes = [8, 128], strides = [1, 1]} : vector<8x896xf32> to vector<8x128xf32>
    %c3 = arith.constant 3 : index
    %c0_63 = arith.constant 0 : index
    %c0_64 = arith.constant 0 : index
    %c0_65 = arith.constant 0 : index
    %93 = vector.load %arg4[%c3, %c0_63, %c0_64, %c0_65] : memref<7x1x128x128xf32, #tpu.memory_space<vmem>>, vector<1x1x128x128xf32>
    %94 = vector.shape_cast %93 : vector<1x1x128x128xf32> to vector<128x128xf32>
    %cst_66 = arith.constant dense<0.000000e+00> : vector<8x128xf32>
    %95 = tpu.matmul %92, %94, %cst_66 {dimension_numbers = #tpu.dot_dimension_numbers<[1], [0], [0], [1], [0, 0, 1, 1], [], []>} : vector<8x128xf32>, vector<128x128xf32>, vector<8x128xf32> -> vector<8x128xf32>
    %c3_67 = arith.constant 3 : index
    %c0_68 = arith.constant 0 : index
    %c0_69 = arith.constant 0 : index
    %c0_70 = arith.constant 0 : index
    %96 = vector.load %arg5[%c3_67, %c0_68, %c0_69, %c0_70] : memref<7x1x1x128xf32, #tpu.memory_space<vmem>>, vector<1x1x1x128xf32>
    %97 = vector.shape_cast %96 : vector<1x1x1x128xf32> to vector<1x128xf32>
    %98 = vector.broadcast %97 : vector<1x128xf32> to vector<8x128xf32>
    %99 = arith.addf %95, %98 : vector<8x128xf32>
    %cst_71 = arith.constant 5.000000e-01 : f32
    %100 = vector.broadcast %cst_71 : f32 to vector<8x128xf32>
    %101 = arith.mulf %100, %99 : vector<8x128xf32>
    %cst_72 = arith.constant 0.707106769 : f32
    %102 = vector.broadcast %cst_72 : f32 to vector<8x128xf32>
    %103 = arith.mulf %99, %102 : vector<8x128xf32>
    %104 = math.erf %103 : vector<8x128xf32>
    %cst_73 = arith.constant 1.000000e+00 : f32
    %105 = vector.broadcast %cst_73 : f32 to vector<8x128xf32>
    %106 = arith.addf %105, %104 : vector<8x128xf32>
    %107 = arith.mulf %101, %106 : vector<8x128xf32>
    %c3_74 = arith.constant 3 : index
    %c0_75 = arith.constant 0 : index
    %c0_76 = arith.constant 0 : index
    %108 = vector.load %arg6[%c3_74, %c0_75, %c0_76] : memref<7x1x128xf32, #tpu.memory_space<vmem>>, vector<1x1x128xf32>
    %109 = vector.shape_cast %108 : vector<1x1x128xf32> to vector<1x128xf32>
    %110 = vector.broadcast %109 : vector<1x128xf32> to vector<8x128xf32>
    %111 = arith.mulf %107, %110 : vector<8x128xf32>
    %cst_77 = arith.constant dense<0.000000e+00> : vector<8xf32>
    %112 = vector.multi_reduction <add>, %111, %cst_77 [1] : vector<8x128xf32> to vector<8xf32>
    %113 = vector.shape_cast %112 : vector<8xf32> to vector<8x1xf32>
    %c3_78 = arith.constant 3 : index
    %c0_79 = arith.constant 0 : index
    %c0_80 = arith.constant 0 : index
    %114 = vector.load %arg7[%c3_78, %c0_79, %c0_80] : memref<7x1x1xf32, #tpu.memory_space<vmem>>, vector<1x1x1xf32>
    %115 = vector.shape_cast %114 : vector<1x1x1xf32> to vector<1x1xf32>
    %116 = vector.broadcast %115 : vector<1x1xf32> to vector<8x1xf32>
    %117 = arith.addf %113, %116 : vector<8x1xf32>
    %118 = vector.extract_strided_slice %13 {offsets = [0, 512], sizes = [8, 128], strides = [1, 1]} : vector<8x896xf32> to vector<8x128xf32>
    %c4 = arith.constant 4 : index
    %c0_81 = arith.constant 0 : index
    %c0_82 = arith.constant 0 : index
    %c0_83 = arith.constant 0 : index
    %119 = vector.load %arg4[%c4, %c0_81, %c0_82, %c0_83] : memref<7x1x128x128xf32, #tpu.memory_space<vmem>>, vector<1x1x128x128xf32>
    %120 = vector.shape_cast %119 : vector<1x1x128x128xf32> to vector<128x128xf32>
    %cst_84 = arith.constant dense<0.000000e+00> : vector<8x128xf32>
    %121 = tpu.matmul %118, %120, %cst_84 {dimension_numbers = #tpu.dot_dimension_numbers<[1], [0], [0], [1], [0, 0, 1, 1], [], []>} : vector<8x128xf32>, vector<128x128xf32>, vector<8x128xf32> -> vector<8x128xf32>
    %c4_85 = arith.constant 4 : index
    %c0_86 = arith.constant 0 : index
    %c0_87 = arith.constant 0 : index
    %c0_88 = arith.constant 0 : index
    %122 = vector.load %arg5[%c4_85, %c0_86, %c0_87, %c0_88] : memref<7x1x1x128xf32, #tpu.memory_space<vmem>>, vector<1x1x1x128xf32>
    %123 = vector.shape_cast %122 : vector<1x1x1x128xf32> to vector<1x128xf32>
    %124 = vector.broadcast %123 : vector<1x128xf32> to vector<8x128xf32>
    %125 = arith.addf %121, %124 : vector<8x128xf32>
    %cst_89 = arith.constant 5.000000e-01 : f32
    %126 = vector.broadcast %cst_89 : f32 to vector<8x128xf32>
    %127 = arith.mulf %126, %125 : vector<8x128xf32>
    %cst_90 = arith.constant 0.707106769 : f32
    %128 = vector.broadcast %cst_90 : f32 to vector<8x128xf32>
    %129 = arith.mulf %125, %128 : vector<8x128xf32>
    %130 = math.erf %129 : vector<8x128xf32>
    %cst_91 = arith.constant 1.000000e+00 : f32
    %131 = vector.broadcast %cst_91 : f32 to vector<8x128xf32>
    %132 = arith.addf %131, %130 : vector<8x128xf32>
    %133 = arith.mulf %127, %132 : vector<8x128xf32>
    %c4_92 = arith.constant 4 : index
    %c0_93 = arith.constant 0 : index
    %c0_94 = arith.constant 0 : index
    %134 = vector.load %arg6[%c4_92, %c0_93, %c0_94] : memref<7x1x128xf32, #tpu.memory_space<vmem>>, vector<1x1x128xf32>
    %135 = vector.shape_cast %134 : vector<1x1x128xf32> to vector<1x128xf32>
    %136 = vector.broadcast %135 : vector<1x128xf32> to vector<8x128xf32>
    %137 = arith.mulf %133, %136 : vector<8x128xf32>
    %cst_95 = arith.constant dense<0.000000e+00> : vector<8xf32>
    %138 = vector.multi_reduction <add>, %137, %cst_95 [1] : vector<8x128xf32> to vector<8xf32>
    %139 = vector.shape_cast %138 : vector<8xf32> to vector<8x1xf32>
    %c4_96 = arith.constant 4 : index
    %c0_97 = arith.constant 0 : index
    %c0_98 = arith.constant 0 : index
    %140 = vector.load %arg7[%c4_96, %c0_97, %c0_98] : memref<7x1x1xf32, #tpu.memory_space<vmem>>, vector<1x1x1xf32>
    %141 = vector.shape_cast %140 : vector<1x1x1xf32> to vector<1x1xf32>
    %142 = vector.broadcast %141 : vector<1x1xf32> to vector<8x1xf32>
    %143 = arith.addf %139, %142 : vector<8x1xf32>
    %144 = vector.extract_strided_slice %13 {offsets = [0, 640], sizes = [8, 128], strides = [1, 1]} : vector<8x896xf32> to vector<8x128xf32>
    %c5 = arith.constant 5 : index
    %c0_99 = arith.constant 0 : index
    %c0_100 = arith.constant 0 : index
    %c0_101 = arith.constant 0 : index
    %145 = vector.load %arg4[%c5, %c0_99, %c0_100, %c0_101] : memref<7x1x128x128xf32, #tpu.memory_space<vmem>>, vector<1x1x128x128xf32>
    %146 = vector.shape_cast %145 : vector<1x1x128x128xf32> to vector<128x128xf32>
    %cst_102 = arith.constant dense<0.000000e+00> : vector<8x128xf32>
    %147 = tpu.matmul %144, %146, %cst_102 {dimension_numbers = #tpu.dot_dimension_numbers<[1], [0], [0], [1], [0, 0, 1, 1], [], []>} : vector<8x128xf32>, vector<128x128xf32>, vector<8x128xf32> -> vector<8x128xf32>
    %c5_103 = arith.constant 5 : index
    %c0_104 = arith.constant 0 : index
    %c0_105 = arith.constant 0 : index
    %c0_106 = arith.constant 0 : index
    %148 = vector.load %arg5[%c5_103, %c0_104, %c0_105, %c0_106] : memref<7x1x1x128xf32, #tpu.memory_space<vmem>>, vector<1x1x1x128xf32>
    %149 = vector.shape_cast %148 : vector<1x1x1x128xf32> to vector<1x128xf32>
    %150 = vector.broadcast %149 : vector<1x128xf32> to vector<8x128xf32>
    %151 = arith.addf %147, %150 : vector<8x128xf32>
    %cst_107 = arith.constant 5.000000e-01 : f32
    %152 = vector.broadcast %cst_107 : f32 to vector<8x128xf32>
    %153 = arith.mulf %152, %151 : vector<8x128xf32>
    %cst_108 = arith.constant 0.707106769 : f32
    %154 = vector.broadcast %cst_108 : f32 to vector<8x128xf32>
    %155 = arith.mulf %151, %154 : vector<8x128xf32>
    %156 = math.erf %155 : vector<8x128xf32>
    %cst_109 = arith.constant 1.000000e+00 : f32
    %157 = vector.broadcast %cst_109 : f32 to vector<8x128xf32>
    %158 = arith.addf %157, %156 : vector<8x128xf32>
    %159 = arith.mulf %153, %158 : vector<8x128xf32>
    %c5_110 = arith.constant 5 : index
    %c0_111 = arith.constant 0 : index
    %c0_112 = arith.constant 0 : index
    %160 = vector.load %arg6[%c5_110, %c0_111, %c0_112] : memref<7x1x128xf32, #tpu.memory_space<vmem>>, vector<1x1x128xf32>
    %161 = vector.shape_cast %160 : vector<1x1x128xf32> to vector<1x128xf32>
    %162 = vector.broadcast %161 : vector<1x128xf32> to vector<8x128xf32>
    %163 = arith.mulf %159, %162 : vector<8x128xf32>
    %cst_113 = arith.constant dense<0.000000e+00> : vector<8xf32>
    %164 = vector.multi_reduction <add>, %163, %cst_113 [1] : vector<8x128xf32> to vector<8xf32>
    %165 = vector.shape_cast %164 : vector<8xf32> to vector<8x1xf32>
    %c5_114 = arith.constant 5 : index
    %c0_115 = arith.constant 0 : index
    %c0_116 = arith.constant 0 : index
    %166 = vector.load %arg7[%c5_114, %c0_115, %c0_116] : memref<7x1x1xf32, #tpu.memory_space<vmem>>, vector<1x1x1xf32>
    %167 = vector.shape_cast %166 : vector<1x1x1xf32> to vector<1x1xf32>
    %168 = vector.broadcast %167 : vector<1x1xf32> to vector<8x1xf32>
    %169 = arith.addf %165, %168 : vector<8x1xf32>
    %170 = vector.extract_strided_slice %13 {offsets = [0, 768], sizes = [8, 128], strides = [1, 1]} : vector<8x896xf32> to vector<8x128xf32>
    %c6 = arith.constant 6 : index
    %c0_117 = arith.constant 0 : index
    %c0_118 = arith.constant 0 : index
    %c0_119 = arith.constant 0 : index
    %171 = vector.load %arg4[%c6, %c0_117, %c0_118, %c0_119] : memref<7x1x128x128xf32, #tpu.memory_space<vmem>>, vector<1x1x128x128xf32>
    %172 = vector.shape_cast %171 : vector<1x1x128x128xf32> to vector<128x128xf32>
    %cst_120 = arith.constant dense<0.000000e+00> : vector<8x128xf32>
    %173 = tpu.matmul %170, %172, %cst_120 {dimension_numbers = #tpu.dot_dimension_numbers<[1], [0], [0], [1], [0, 0, 1, 1], [], []>} : vector<8x128xf32>, vector<128x128xf32>, vector<8x128xf32> -> vector<8x128xf32>
    %c6_121 = arith.constant 6 : index
    %c0_122 = arith.constant 0 : index
    %c0_123 = arith.constant 0 : index
    %c0_124 = arith.constant 0 : index
    %174 = vector.load %arg5[%c6_121, %c0_122, %c0_123, %c0_124] : memref<7x1x1x128xf32, #tpu.memory_space<vmem>>, vector<1x1x1x128xf32>
    %175 = vector.shape_cast %174 : vector<1x1x1x128xf32> to vector<1x128xf32>
    %176 = vector.broadcast %175 : vector<1x128xf32> to vector<8x128xf32>
    %177 = arith.addf %173, %176 : vector<8x128xf32>
    %cst_125 = arith.constant 5.000000e-01 : f32
    %178 = vector.broadcast %cst_125 : f32 to vector<8x128xf32>
    %179 = arith.mulf %178, %177 : vector<8x128xf32>
    %cst_126 = arith.constant 0.707106769 : f32
    %180 = vector.broadcast %cst_126 : f32 to vector<8x128xf32>
    %181 = arith.mulf %177, %180 : vector<8x128xf32>
    %182 = math.erf %181 : vector<8x128xf32>
    %cst_127 = arith.constant 1.000000e+00 : f32
    %183 = vector.broadcast %cst_127 : f32 to vector<8x128xf32>
    %184 = arith.addf %183, %182 : vector<8x128xf32>
    %185 = arith.mulf %179, %184 : vector<8x128xf32>
    %c6_128 = arith.constant 6 : index
    %c0_129 = arith.constant 0 : index
    %c0_130 = arith.constant 0 : index
    %186 = vector.load %arg6[%c6_128, %c0_129, %c0_130] : memref<7x1x128xf32, #tpu.memory_space<vmem>>, vector<1x1x128xf32>
    %187 = vector.shape_cast %186 : vector<1x1x128xf32> to vector<1x128xf32>
    %188 = vector.broadcast %187 : vector<1x128xf32> to vector<8x128xf32>
    %189 = arith.mulf %185, %188 : vector<8x128xf32>
    %cst_131 = arith.constant dense<0.000000e+00> : vector<8xf32>
    %190 = vector.multi_reduction <add>, %189, %cst_131 [1] : vector<8x128xf32> to vector<8xf32>
    %191 = vector.shape_cast %190 : vector<8xf32> to vector<8x1xf32>
    %c6_132 = arith.constant 6 : index
    %c0_133 = arith.constant 0 : index
    %c0_134 = arith.constant 0 : index
    %192 = vector.load %arg7[%c6_132, %c0_133, %c0_134] : memref<7x1x1xf32, #tpu.memory_space<vmem>>, vector<1x1x1xf32>
    %193 = vector.shape_cast %192 : vector<1x1x1xf32> to vector<1x1xf32>
    %194 = vector.broadcast %193 : vector<1x1xf32> to vector<8x1xf32>
    %195 = arith.addf %191, %194 : vector<8x1xf32>
    %cst_135 = arith.constant 0.000000e+00 : f32
    %196 = vector.broadcast %cst_135 : f32 to vector<8x1xf32>
    %197 = arith.addf %196, %39 : vector<8x1xf32>
    %198 = arith.addf %197, %65 : vector<8x1xf32>
    %199 = arith.addf %198, %91 : vector<8x1xf32>
    %200 = arith.addf %199, %117 : vector<8x1xf32>
    %201 = arith.addf %200, %143 : vector<8x1xf32>
    %cst_136 = arith.constant 2.000000e-01 : f32
    %202 = vector.broadcast %cst_136 : f32 to vector<8x1xf32>
    %203 = arith.mulf %201, %202 : vector<8x1xf32>
    %204 = tpu.concatenate %203, %169, %195 in 1 : vector<8x1xf32>, vector<8x1xf32>, vector<8x1xf32> -> vector<8x3xf32>
    %c0_137 = arith.constant 0 : index
    %c0_138 = arith.constant 0 : index
    %205 = vector.load %arg8[%c0_137, %c0_138] : memref<8x3xf32, #tpu.memory_space<vmem>>, vector<8x3xf32>
    tpu.vector_store %arg8[%c0_137, %c0_138], %204 {strides = array<i32>} : memref<8x3xf32, #tpu.memory_space<vmem>>, vector<8x3xf32>,
    return
  }
  func.func @transform_0(%arg0: i32) -> (i32, i32) {
    %c0_i32 = arith.constant 0 : i32
    %c0_i32_0 = arith.constant 0 : i32
    %c0_i32_1 = arith.constant 0 : i32
    return %c0_i32, %c0_i32_0 : i32, i32
  }
  func.func @transform_1(%arg0: i32) -> (i32, i32) {
    %c0_i32 = arith.constant 0 : i32
    %c0_i32_0 = arith.constant 0 : i32
    %c0_i32_1 = arith.constant 0 : i32
    return %c0_i32, %c0_i32_0 : i32, i32
  }
  func.func @transform_2(%arg0: i32) -> (i32, i32) {
    %c0_i32 = arith.constant 0 : i32
    %c0_i32_0 = arith.constant 0 : i32
    %c0_i32_1 = arith.constant 0 : i32
    return %c0_i32, %c0_i32_0 : i32, i32
  }
  func.func @transform_3(%arg0: i32) -> (i32, i32, i32, i32) {
    %c0_i32 = arith.constant 0 : i32
    %c0_i32_0 = arith.constant 0 : i32
    %c0_i32_1 = arith.constant 0 : i32
    %c0_i32_2 = arith.constant 0 : i32
    %c0_i32_3 = arith.constant 0 : i32
    return %c0_i32, %c0_i32_0, %c0_i32_1, %c0_i32_2 : i32, i32, i32, i32
  }
  func.func @transform_4(%arg0: i32) -> (i32, i32, i32, i32) {
    %c0_i32 = arith.constant 0 : i32
    %c0_i32_0 = arith.constant 0 : i32
    %c0_i32_1 = arith.constant 0 : i32
    %c0_i32_2 = arith.constant 0 : i32
    %c0_i32_3 = arith.constant 0 : i32
    return %c0_i32, %c0_i32_0, %c0_i32_1, %c0_i32_2 : i32, i32, i32, i32
  }
  func.func @transform_5(%arg0: i32) -> (i32, i32, i32) {
    %c0_i32 = arith.constant 0 : i32
    %c0_i32_0 = arith.constant 0 : i32
    %c0_i32_1 = arith.constant 0 : i32
    %c0_i32_2 = arith.constant 0 : i32
    return %c0_i32, %c0_i32_0, %c0_i32_1 : i32, i32, i32
  }
  func.func @transform_6(%arg0: i32) -> (i32, i32, i32) {
    %c0_i32 = arith.constant 0 : i32
    %c0_i32_0 = arith.constant 0 : i32
    %c0_i32_1 = arith.constant 0 : i32
    %c0_i32_2 = arith.constant 0 : i32
    return %c0_i32, %c0_i32_0, %c0_i32_1 : i32, i32, i32
  }
  func.func @transform_7(%arg0: i32) -> (i32, i32) {
    %c0_i32 = arith.constant 0 : i32
    %c0_i32_0 = arith.constant 0 : i32
    %c0_i32_1 = arith.constant 0 : i32
    return %c0_i32, %c0_i32_0 : i32, i32
  }
}

</mosaic_0001>

<bundles_post_ra>
// kernel: tpu_custom_call.1
= control target key start
LH: loop header
LB: loop body
LE: loop exit
PB: predicated region body
PF: predicated region fallthrough
CT: control target
= control target key end

     0   :  { %12 = vsyncpa [#allocation3], 0  ;;  %s2177_s0 = inlined_call_operand.vmem [shape: f32[8,32], index: 0, kind: input, shape index: {}]   ;;  %s2178_s1 = inlined_call_operand.hbm [shape: f32[32,896], index: 1, kind: input, shape index: {}]   ;;  %s2179_s2 = inlined_call_operand.hbm [shape: f32[1,896], index: 2, kind: input, shape index: {}]   ;;  %s2180_s3 = inlined_call_operand.hbm [shape: f32[7,1,128,128], index: 3, kind: input, shape index: {}]   ;;  %s2181_s4 = inlined_call_operand.vmem [shape: f32[7,1,1,128], index: 4, kind: input, shape index: {}]   ;;  %s2182_s5 = inlined_call_operand.hbm [shape: f32[7,1,128], index: 5, kind: input, shape index: {}]   ;;  %s2183_s6 = inlined_call_operand.vmem [shape: f32[7,1,1], index: 6, kind: input, shape index: {}]   ;;  %s2184_s7 = inlined_call_operand.vmem [shape: f32[8,3], index: 7, kind: output, shape index: {}]  }
   0x1   :  { %13 = vsyncpa [#allocation5], 0 }
   0x2   :  { %14 = vsyncpa [#allocation8], 0  ;;  %s1874_s24 = smov [#allocation4]   ;;  %s1875_s26 = smov [#allocation2]  }
   0x3   :  { %s35_s25 = sshll.u32 %s1874_s24, 4  ;;  %s22_s27 = sshll.u32 %s1875_s26, 4  ;;  %s36_s25 = int_to_ptr.vmem [resolvable:$true] %s35_s25  ;;  %s23_s27 = int_to_ptr.vmem [resolvable:$true] %s22_s27 }
   0x4   :  { %s1796_s28 = scalar_lea.vmem %s36_s25, 112  ;;  %s1800_s29 = scalar_lea.vmem %s36_s25, 128 }
   0x5   :  { %p1797_p0 = scmp.ne.s32.totalorder %s36_s25, %s1796_s28  ;;  %p1801_p1 = scmp.lt.s32.totalorder %s36_s25, %s36_s25 }
   0x6   :  { %p1802_p2 = scmp.lt.s32.totalorder %s1800_s29, %s1796_s28 }
   0x8   :  { %p1803_p3 = por %p1802_p2, %p1801_p1 }
   0xa   :  { %p1804_p4 = pnand %p1803_p3, %p1797_p0 }
   0xc   :  { %1807 = shalt.err (!%p1804_p4)
}
   0xd   :  { %38 = dma.hbm_to_vmem [thread:$0]  %s2179_s2, 112, %s36_s25, [#allocation5]  }
   0xe   :  { %s1816_s9 = scalar_lea.vmem %s23_s27, 3584  ;;  %p1821_p6 = scmp.lt.s32.totalorder %s23_s27, %s23_s27 }
   0xf   :  { %p1817_p5 = scmp.ne.s32.totalorder %s23_s27, %s1816_s9  ;;  %p1822_p7 = scmp.lt.s32.totalorder %s1816_s9, %s1816_s9 }
  0x11   :  { %p1823_p8 = por %p1822_p7, %p1821_p6 }
  0x13   :  { %p1824_p9 = pnand %p1823_p8, %p1817_p5 }
  0x15   :  { %1827 = shalt.err (!%p1824_p9)
}
  0x16   :  { %s1876_s10 = smov 896   ;;  %s1877_s11 = smov 56  }
  0x17   :  { %28 = dma.hbm_to_vmem [thread:$0]  %s2178_s1, 3584, %s23_s27, [#allocation3], %s1876_s10, %s1876_s10, %s1877_s11  }
  0x18   :  { %s1878_s14 = smov [#allocation6]  }
  0x19   :  { %s44_s15 = sshll.u32 %s1878_s14, 4  ;;  %s45_s15 = int_to_ptr.vmem [resolvable:$true] %s44_s15 }
  0x1a   :  { %s1836_s16 = scalar_lea.vmem %s45_s15, 14336  ;;  %p1841_p11 = scmp.lt.s32.totalorder %s45_s15, %s45_s15 }
  0x1b   :  { %p1837_p10 = scmp.ne.s32.totalorder %s45_s15, %s1836_s16  ;;  %p1842_p12 = scmp.lt.s32.totalorder %s1836_s16, %s1836_s16 }
  0x1d   :  { %p1843_p13 = por %p1842_p12, %p1841_p11 }
  0x1f   :  { %p1844_p0 = pnand %p1843_p13, %p1837_p10 }
  0x21   :  { %1847 = shalt.err (!%p1844_p0)
}
  0x22   :  { %s1879_s2 = smov 128   ;;  %s1880_s17 = smov 8  }
  0x23   :  { %50 = dma.hbm_to_vmem [thread:$0]  %s2180_s3, 14336, %s45_s15, [#allocation5], %s1879_s2, %s1879_s2, %s1880_s17  }
  0x24   :  { %s1881_s20 = smov [#allocation7]  }
  0x25   :  { %s58_s21 = sshll.u32 %s1881_s20, 4  ;;  %s59_s21 = int_to_ptr.vmem [resolvable:$true] %s58_s21 }
  0x26   :  { %s1856_s1 = scalar_lea.vmem %s59_s21, 112  ;;  %s1860_s22 = scalar_lea.vmem %s59_s21, 128 }
  0x27   :  { %p1857_p1 = scmp.ne.s32.totalorder %s59_s21, %s1856_s1  ;;  %p1861_p2 = scmp.lt.s32.totalorder %s59_s21, %s59_s21 }
  0x28   :  { %p1862_p3 = scmp.lt.s32.totalorder %s1860_s22, %s1856_s1 }
  0x2a   :  { %p1863_p4 = por %p1862_p3, %p1861_p2 }
  0x2c   :  { %p1864_p5 = pnand %p1863_p4, %p1857_p1 }
  0x2e   :  { %1867 = shalt.err (!%p1864_p5)
}
  0x2f   :  { %s1882_s23 = smov 16   ;;  %s1883_s24 = smov 1  }
  0x30   :  { %64 = dma.hbm_to_vmem [thread:$0]  %s2182_s5, 112, %s59_s21, [#allocation8], %s1882_s23, %s1882_s23, %s1883_s24  }
  0x31   :  { %1868 = dma.done.wait [#allocation3], 3584  }
  0x32   :  { %1869 = vsyncadd [#allocation3], 4294963712 }
  0x33   :  { %1870 = dma.done.wait [#allocation5], 14448  }
  0x34   :  { %1871 = vsyncadd [#allocation5], 4294952848 }
  0x35   :  { %1872 = dma.done.wait [#allocation8], 112  }
  0x36   :  { %1873 = vsyncadd [#allocation8], 4294967184  ;;  %v1884_v0 = vmov 0.0   ;;  %vm1885_vm0 = vmmov 0   ;;  %v102_v1 = vld [vmem:[#allocation2 + $0xb0] sm:$0xff]  ;;  %v101_v2 = vld [vmem:[#allocation2 + $0xa8] sm:$0xff]  ;;  %v110_v62 = vlaneseq }
  0x37   :  { %213 = vmatprep.mubr.f32.mxu1 %v1884_v0  ;;  %1502 = vmatprep.subr.mxu0 %v1884_v0  ;;  %v95_v3 = vld [vmem:[#allocation2 + $0x78] sm:$0xff]  ;;  %v94_v4 = vld [vmem:[#allocation2 + $0x70] sm:$0xff]  ;;  %v88_v5 = vld [vmem:[#allocation2 + $0x40] sm:$0xff]  ;;  %vm145_vm1 = vcmask 261120   ;;  %s1886_s19 = smov 2   ;;  %vm1317_vm2 = vcmask 7168  }
  0x38   :  { %1534 = vmatprep.mubr.msk.f32.mxu0 %vm1885_vm0, %v1884_v0  ;;  %173 = vmatprep.subr.mxu1 %v102_v1  ;;  %v87_v6 = vld [vmem:[#allocation2 + $0x38] sm:$0xff]  ;;  %v81_v7 = vld [vmem:[#allocation2 + $0x8] sm:$0xff]  ;;  %v80_v8 = vld [vmem:[#allocation2] sm:$0xff]  ;;  %v2000_v63 = vshrl.u32 %v110_v62, 7  ;;  %vm1319_vm3 = vcmask 15360   ;;  %vm1321_vm4 = vcmask 23552  }
  0x39   :  { %174 = vmatpush1.msra.mxu1 %v101_v2  ;;  %v1947_v9 = vld [vmem:[%s2177_s0] sm:$0xff]  ;;  %v103_v11 = vld [vmem:[#allocation2 + $0xb8] sm:$0xff]  ;;  %v97_v12 = vld [vmem:[#allocation2 + $0x88] sm:$0xff] }
  0x3a   :  { %175 = vmatprep.subr.mxu1 %v95_v3  ;;  %v104_v10 = vld [vmem:[#allocation2 + $0xc0] sm:$0xff]  ;;  %v90_v15 = vld [vmem:[#allocation2 + $0x50] sm:$0xff]  ;;  %v481_v16 = vld [vmem:[#allocation6 + $0x70] sm:$0xff]  ;;  %v112_v1 = vsub.s32 0, %v2000_v63  ;;  %v116_v3 = vsub.s32 1, %v2000_v63 }
  0x3b   :  { %176 = vmatpush1.msra.mxu1 %v94_v4  ;;  %v96_v13 = vld [vmem:[#allocation2 + $0x80] sm:$0xff]  ;;  %v89_v17 = vld [vmem:[#allocation2 + $0x48] sm:$0xff]  ;;  %v83_v18 = vld [vmem:[#allocation2 + $0x18] sm:$0xff] }
  0x3c   :  { %177 = vmatprep.subr.mxu1 %v88_v5  ;;  %v482_v14 = vld [vmem:[#allocation6 + $0x78] sm:$0xff]  ;;  %v480_v19 = vld [vmem:[#allocation6 + $0x68] sm:$0xff]  ;;  %v105_v22 = vld [vmem:[#allocation2 + $0xc8] sm:$0xff] }
  0x3d   :  { %178 = vmatpush1.msra.mxu1 %v87_v6  ;;  %1503 = vmatpush3.msra.mxu0 %v482_v14  ;;  %v82_v20 = vld [vmem:[#allocation2 + $0x10] sm:$0xff]  ;;  %v99_v23 = vld [vmem:[#allocation2 + $0x98] sm:$0xff]  ;;  %v479_v24 = vld [vmem:[#allocation6 + $0x60] sm:$0xff]  ;;  %v120_v14 = vsub.s32 2, %v2000_v63 }
  0x3e   :  { %179 = vmatprep.subr.mxu1 %v81_v7  ;;  %1504 = vmatprep.subr.mxu0 %v1884_v0  ;;  %v106_v21 = vld [vmem:[#allocation2 + $0xd0] sm:$0xff]  ;;  %v92_v26 = vld [vmem:[#allocation2 + $0x60] sm:$0xff]  ;;  %v91_v28 = vld [vmem:[#allocation2 + $0x58] sm:$0xff] }
  0x3f   :  { %180 = vmatpush1.msra.mxu1 %v80_v8  ;;  %1505 = vmatpush3.msra.mxu0 %v481_v16  ;;  %v98_v25 = vld [vmem:[#allocation2 + $0x90] sm:$0xff]  ;;  %v478_v27 = vld [vmem:[#allocation6 + $0x58] sm:$0xff]  ;;  %v85_v29 = vld [vmem:[#allocation2 + $0x28] sm:$0xff] }
  0x40   :  { %1330 = vmatmul.mubr.msk.f32.vlgmr.msra.gmra.mxu1 %vm145_vm1, %v1947_v9  ;;  %244 = vmatprep.subr.mxu1 %v104_v10  ;;  %v84_v30 = vld [vmem:[#allocation2 + $0x20] sm:$0xff]  ;;  %v107_v31 = vld [vmem:[#allocation2 + $0xd8] sm:$0xff]  ;;  %v93_v33 = vld [vmem:[#allocation2 + $0x68] sm:$0xff] }
  0x41   :  { %245 = vmatpush1.msra.mxu1 %v103_v11  ;;  %284 = vmatprep.mubr.f32.mxu1 %v1884_v0  ;;  %v100_v32 = vld [vmem:[#allocation2 + $0xa0] sm:$0xff]  ;;  %v86_v34 = vld [vmem:[#allocation2 + $0x30] sm:$0xff]  ;;  %v598_v36 = vld [vmem:[#allocation6 + $0xf0] sm:$0xff] }
  0x42   :  { %246 = vmatprep.subr.mxu1 %v97_v12  ;;  %1506 = vmatprep.subr.mxu0 %v1884_v0  ;;  %v599_v35 = vld [vmem:[#allocation6 + $0xf8] sm:$0xff]  ;;  %v597_v37 = vld [vmem:[#allocation6 + $0xe8] sm:$0xff]  ;;  %v596_v38 = vld [vmem:[#allocation6 + $0xe0] sm:$0xff] }
  0x43   :  { %247 = vmatpush1.msra.mxu1 %v96_v13  ;;  %1507 = vmatpush3.msra.mxu0 %v480_v19  ;;  %v477_v39 = vld [vmem:[#allocation6 + $0x50] sm:$0xff]  ;;  %v595_v40 = vld [vmem:[#allocation6 + $0xd8] sm:$0xff]  ;;  %v476_v41 = vld [vmem:[#allocation6 + $0x48] sm:$0xff] }
  0x44   :  { %248 = vmatprep.subr.mxu1 %v90_v15  ;;  %1508 = vmatprep.subr.mxu0 %v1884_v0  ;;  %v594_v42 = vld [vmem:[#allocation6 + $0xd0] sm:$0xff]  ;;  %v475_v43 = vld [vmem:[#allocation6 + $0x40] sm:$0xff]  ;;  %v593_v44 = vld [vmem:[#allocation6 + $0xc8] sm:$0xff] }
  0x45   :  { %249 = vmatpush1.msra.mxu1 %v89_v17  ;;  %1509 = vmatpush3.msra.mxu0 %v479_v24  ;;  %v474_v45 = vld [vmem:[#allocation6 + $0x38] sm:$0xff]  ;;  %v592_v46 = vld [vmem:[#allocation6 + $0xc0] sm:$0xff]  ;;  %v473_v47 = vld [vmem:[#allocation6 + $0x30] sm:$0xff] }
  0x46   :  { %250 = vmatprep.subr.mxu1 %v83_v18  ;;  %1510 = vmatprep.subr.mxu0 %v1884_v0  ;;  %v591_v48 = vld [vmem:[#allocation6 + $0xb8] sm:$0xff]  ;;  %v472_v49 = vld [vmem:[#allocation6 + $0x28] sm:$0xff]  ;;  %v590_v50 = vld [vmem:[#allocation6 + $0xb0] sm:$0xff] }
  0x47   :  { %251 = vmatpush1.msra.mxu1 %v82_v20  ;;  %1511 = vmatpush3.msra.mxu0 %v478_v27  ;;  %v471_v51 = vld [vmem:[#allocation6 + $0x20] sm:$0xff]  ;;  %v589_v52 = vld [vmem:[#allocation6 + $0xa8] sm:$0xff]  ;;  %v470_v53 = vld [vmem:[#allocation6 + $0x18] sm:$0xff]  ;;  %v124_v20 = vsub.s32 3, %v2000_v63 }
  0x48   :  { %1331 = vmatmul.mubr.msk.f32.vlgmr.msra.gmra.mxu1 %vm145_vm1, %v1947_v9  ;;  %315 = vmatprep.subr.mxu1 %v106_v21  ;;  %v588_v54 = vld [vmem:[#allocation6 + $0xa0] sm:$0xff]  ;;  %v469_v55 = vld [vmem:[#allocation6 + $0x10] sm:$0xff]  ;;  %v587_v56 = vld [vmem:[#allocation6 + $0x98] sm:$0xff] }
  0x49   :  { %316 = vmatpush1.msra.mxu1 %v105_v22  ;;  %355 = vmatprep.mubr.f32.mxu1 %v1884_v0  ;;  %v468_v57 = vld [vmem:[#allocation6 + $0x8] sm:$0xff]  ;;  %v586_v58 = vld [vmem:[#allocation6 + $0x90] sm:$0xff]  ;;  %v467_v59 = vld [vmem:[#allocation6] sm:$0xff] }
  0x4a   :  { %317 = vmatprep.subr.mxu1 %v99_v23  ;;  %1512 = vmatprep.subr.mxu0 %v1884_v0  ;;  %v585_v60 = vld [vmem:[#allocation6 + $0x88] sm:$0xff]  ;;  %v584_v61 = vld [vmem:[#allocation6 + $0x80] sm:$0xff]  ;;  %v2003_v2 = vld [vmem:[#allocation4] sm:$0xff] }
  0x4b   :  { %318 = vmatpush1.msra.mxu1 %v98_v25  ;;  %1513 = vmatpush3.msra.mxu0 %v477_v39  ;;  %v113_v4 = vrot.slane %v2003_v2, %v112_v1  ;;  %v117_v5 = vrot.slane %v2003_v2, %v116_v3  ;;  %v121_v23 = vrot.slane %v2003_v2, %v120_v14  ;;  %v719_v25 = vld [vmem:[#allocation6 + $0x178] sm:$0xff] }
  0x4c   :  { %319 = vmatprep.subr.mxu1 %v92_v26  ;;  %1514 = vmatprep.subr.mxu0 %v1884_v0  ;;  %v959_v14 = vld [vmem:[#allocation6 + $0x278] sm:$0xff] }
  0x4d   :  { %320 = vmatpush1.msra.mxu1 %v91_v28  ;;  %1515 = vmatpush3.msra.mxu0 %v476_v41  ;;  %v718_v28 = vld [vmem:[#allocation6 + $0x170] sm:$0xff]  ;;  %v836_v41 = vld [vmem:[#allocation6 + $0x1e0] sm:$0xff] }
  0x4e   :  { %321 = vmatprep.subr.mxu1 %v85_v29  ;;  %1516 = vmatprep.subr.mxu0 %v1884_v0  ;;  %v839_v29 = vld [vmem:[#allocation6 + $0x1f8] sm:$0xff] }
  0x4f   :  { %322 = vmatpush1.msra.mxu1 %v84_v30  ;;  %1517 = vmatpush3.msra.mxu0 %v475_v43  ;;  %v125_v30 = vrot.slane %v2003_v2, %v124_v20  ;;  %v835_v43 = vld [vmem:[#allocation6 + $0x1d8] sm:$0xff] }
  0x50   :  { %1332 = vmatmul.mubr.msk.f32.vlgmr.msra.gmra.mxu1 %vm145_vm1, %v1947_v9  ;;  %1491 = vmatprep.subr.mxu1 %v1884_v0 }
  0x51   :  { %1492 = vmatpush3.msra.mxu1 %v107_v31  ;;  %1499 = vmatprep.mubr.msk.f32.mxu1 %vm1885_vm0, %v1884_v0 }
  0x52   :  { %1493 = vmatprep.subr.mxu1 %v1884_v0  ;;  %1518 = vmatprep.subr.mxu0 %v1884_v0 }
  0x53   :  { %1494 = vmatpush3.msra.mxu1 %v100_v32  ;;  %1519 = vmatpush3.msra.mxu0 %v474_v45  ;;  %v713_v45 = vld [vmem:[#allocation6 + $0x148] sm:$0xff] }
  0x54   :  { %1495 = vmatprep.subr.mxu1 %v1884_v0  ;;  %1520 = vmatprep.subr.mxu0 %v1884_v0 }
  0x55   :  { %1496 = vmatpush3.msra.mxu1 %v93_v33  ;;  %1521 = vmatpush3.msra.mxu0 %v473_v47  ;;  %v717_v33 = vld [vmem:[#allocation6 + $0x168] sm:$0xff]  ;;  %v712_v47 = vld [vmem:[#allocation6 + $0x140] sm:$0xff] }
  0x56   :  { %1497 = vmatprep.subr.mxu1 %v1884_v0  ;;  %1522 = vmatprep.subr.mxu0 %v1884_v0 }
  0x57   :  { %1498 = vmatpush3.msra.mxu1 %v86_v34  ;;  %1523 = vmatpush3.msra.mxu0 %v472_v49  ;;  %v838_v34 = vld [vmem:[#allocation6 + $0x1f0] sm:$0xff]  ;;  %v711_v49 = vld [vmem:[#allocation6 + $0x138] sm:$0xff] }
  0x58   :  { %1500 = vmatmul.mubr.msk.f32.vlgmr.msra.gmra.mxu1 %vm145_vm1, %v1947_v9  ;;  %1537 = vmatprep.subr.mxu1 %v1884_v0 }
  0x59   :  { %1538 = vmatpush3.msra.mxu1 %v599_v35  ;;  %1569 = vmatprep.mubr.msk.f32.mxu1 %vm1885_vm0, %v1884_v0 }
  0x5a   :  { %1539 = vmatprep.subr.mxu1 %v1884_v0  ;;  %1524 = vmatprep.subr.mxu0 %v1884_v0 }
  0x5b   :  { %1540 = vmatpush3.msra.mxu1 %v598_v36  ;;  %1525 = vmatpush3.msra.mxu0 %v471_v51  ;;  %v716_v36 = vld [vmem:[#allocation6 + $0x160] sm:$0xff]  ;;  %v710_v51 = vld [vmem:[#allocation6 + $0x130] sm:$0xff] }
  0x5c   :  { %1541 = vmatprep.subr.mxu1 %v1884_v0  ;;  %1526 = vmatprep.subr.mxu0 %v1884_v0 }
  0x5d   :  { %1542 = vmatpush3.msra.mxu1 %v597_v37  ;;  %1527 = vmatpush3.msra.mxu0 %v470_v53  ;;  %v837_v37 = vld [vmem:[#allocation6 + $0x1e8] sm:$0xff] }
  0x5e   :  { %1543 = vmatprep.subr.mxu1 %v1884_v0  ;;  %1528 = vmatprep.subr.mxu0 %v1884_v0  ;;  %v709_v53 = vld [vmem:[#allocation6 + $0x128] sm:$0xff] }
  0x5f   :  { %1544 = vmatpush3.msra.mxu1 %v596_v38  ;;  %1529 = vmatpush3.msra.mxu0 %v469_v55  ;;  %v708_v55 = vld [vmem:[#allocation6 + $0x120] sm:$0xff] }
  0x60   :  { %1545 = vmatprep.subr.mxu1 %v1884_v0  ;;  %1530 = vmatprep.subr.mxu0 %v1884_v0 }
  0x61   :  { %1546 = vmatpush3.msra.mxu1 %v595_v40  ;;  %1531 = vmatpush3.msra.mxu0 %v468_v57  ;;  %v715_v40 = vld [vmem:[#allocation6 + $0x158] sm:$0xff] }
  0x62   :  { %1547 = vmatprep.subr.mxu1 %v1884_v0  ;;  %1532 = vmatprep.subr.mxu0 %v1884_v0  ;;  %v707_v57 = vld [vmem:[#allocation6 + $0x118] sm:$0xff] }
  0x63   :  { %1548 = vmatpush3.msra.mxu1 %v594_v42  ;;  %1533 = vmatpush3.msra.mxu0 %v467_v59  ;;  %v714_v42 = vld [vmem:[#allocation6 + $0x150] sm:$0xff] }
  0x64   :  { %1549 = vmatprep.subr.mxu1 %v1884_v0  ;;  %1572 = vmatprep.subr.mxu0 %v1884_v0 }
  0x65   :  { %1550 = vmatpush3.msra.mxu1 %v593_v44 }
  0x66   :  { %1551 = vmatprep.subr.mxu1 %v1884_v0 }
  0x67   :  { %1552 = vmatpush3.msra.mxu1 %v592_v46  ;;  %v834_v46 = vld [vmem:[#allocation6 + $0x1d0] sm:$0xff] }
  0x68   :  { %1553 = vmatprep.subr.mxu1 %v1884_v0 }
  0x69   :  { %1554 = vmatpush3.msra.mxu1 %v591_v48  ;;  %v833_v48 = vld [vmem:[#allocation6 + $0x1c8] sm:$0xff] }
  0x6a   :  { %1555 = vmatprep.subr.mxu1 %v1884_v0 }
  0x6b   :  { %1556 = vmatpush3.msra.mxu1 %v590_v50  ;;  %v832_v50 = vld [vmem:[#allocation6 + $0x1c0] sm:$0xff] }
  0x6c   :  { %1557 = vmatprep.subr.mxu1 %v1884_v0 }
  0x6d   :  { %1558 = vmatpush3.msra.mxu1 %v589_v52  ;;  %v831_v52 = vld [vmem:[#allocation6 + $0x1b8] sm:$0xff] }
  0x6e   :  { %1559 = vmatprep.subr.mxu1 %v1884_v0 }
  0x6f   :  { %1560 = vmatpush3.msra.mxu1 %v588_v54  ;;  %v830_v54 = vld [vmem:[#allocation6 + $0x1b0] sm:$0xff] }
  0x70   :  { %1561 = vmatprep.subr.mxu1 %v1884_v0 }
  0x71   :  { %1562 = vmatpush3.msra.mxu1 %v587_v56  ;;  %v829_v56 = vld [vmem:[#allocation6 + $0x1a8] sm:$0xff] }
  0x72   :  { %1563 = vmatprep.subr.mxu1 %v1884_v0 }
  0x73   :  { %1564 = vmatpush3.msra.mxu1 %v586_v58  ;;  %v828_v58 = vld [vmem:[#allocation6 + $0x1a0] sm:$0xff] }
  0x74   :  { %1565 = vmatprep.subr.mxu1 %v1884_v0 }
  0x75   :  { %1566 = vmatpush3.msra.mxu1 %v585_v60  ;;  %v706_v60 = vld [vmem:[#allocation6 + $0x110] sm:$0xff] }
  0x76   :  { %1567 = vmatprep.subr.mxu1 %v1884_v0 }
  0x77   :  { %1568 = vmatpush3.msra.mxu1 %v584_v61  ;;  %v827_v61 = vld [vmem:[#allocation6 + $0x198] sm:$0xff] }
  0x78   :  { %1607 = vmatprep.subr.mxu1 %v1884_v0 }
 0x100   :  { %v215_v6 = vpop.f32.mrf.mxu1 }
 0x101   :  { %v216_v7 = vadd.f32 %v215_v6, %v113_v4  ;;  %v705_v4 = vld [vmem:[#allocation6 + $0x108] sm:$0xff]  ;;  %v128_v6 = vsub.s32 4, %v2000_v63 }
 0x102   :  { %v217_v8 = vpop.f32.mrf.mxu1 }
 0x103   :  { %v439_v9 = vmul.f32 0.70710677, %v216_v7  ;;  %v218_v10 = vadd.f32 %v217_v8, %v117_v5  ;;  %v432_v17 = vmul.f32 0.5, %v216_v7  ;;  %v826_v5 = vld [vmem:[#allocation6 + $0x190] sm:$0xff]  ;;  %v704_v7 = vld [vmem:[#allocation6 + $0x100] sm:$0xff]  ;;  %v825_v8 = vld [vmem:[#allocation6 + $0x188] sm:$0xff] }
 0x105   :  { %1760 = verf.f32 %v439_v9  ;;  %v440_v11 = vmul.f32 0.70710677, %v218_v10  ;;  %v433_v21 = vmul.f32 0.5, %v218_v10 }
 0x107   :  { %1762 = verf.f32 %v440_v11 }
 0x108   :  { %v286_v12 = vpop.f32.mrf.mxu1 }
 0x109   :  { %v2020_v32 = vadd.f32 %v286_v12, %v121_v23  ;;  %v824_v12 = vld [vmem:[#allocation6 + $0x180] sm:$0xff]  ;;  %v1078_v23 = vld [vmem:[#allocation6 + $0x2f0] sm:$0xff] }
 0x10a   :  { %v288_v13 = vpop.f32.mrf.mxu1 }
 0x10b   :  { %v2025_v38 = vadd.f32 %v288_v13, %v125_v30  ;;  %v441_v39 = vmul.f32 0.70710677, %v2020_v32  ;;  %v434_v1 = vmul.f32 0.5, %v2020_v32  ;;  %v132_v13 = vsub.s32 5, %v2000_v63  ;;  %v954_v30 = vld [vmem:[#allocation6 + $0x250] sm:$0xff]  ;;  %v1075_v32 = vld [vmem:[#allocation6 + $0x2d8] sm:$0xff] }
 0x10d   :  { %v442_v44 = vmul.f32 0.70710677, %v2025_v38  ;;  %1764 = verf.f32 %v441_v39  ;;  %v435_v9 = vmul.f32 0.5, %v2025_v38  ;;  %v133_v20 = vrot.slane %v2003_v2, %v132_v13  ;;  %v1072_v38 = vld [vmem:[#allocation6 + $0x2c0] sm:$0xff]  ;;  %v950_v39 = vld [vmem:[#allocation6 + $0x230] sm:$0xff] }
 0x10e   :  { %v1188_v13 = vld [vmem:[#allocation6 + $0x320] sm:$0xff] }
 0x10f   :  { %1766 = verf.f32 %v442_v44  ;;  %v1069_v44 = vld [vmem:[#allocation6 + $0x2a8] sm:$0xff] }
 0x110   :  { %v2009_v16 = vpop.f32.mrf.mxu1 }
 0x112   :  { %v1761_v15 = vpop.eup %1760  ;;  %v2013_v26 = vpop.f32.mrf.mxu1 }
 0x113   :  { %v453_v18 = vadd.f32 1.0, %v1761_v15  ;;  %v129_v15 = vrot.slane %v2003_v2, %v128_v6 }
 0x114   :  { %v1763_v19 = vpop.eup %1762 }
 0x115   :  { %v454_v22 = vadd.f32 1.0, %v1763_v19  ;;  %v460_v24 = vmul.f32 %v453_v18, %v432_v17  ;;  %v958_v18 = vld [vmem:[#allocation6 + $0x270] sm:$0xff]  ;;  %v1079_v19 = vld [vmem:[#allocation6 + $0x2f8] sm:$0xff] }
 0x117   :  { %v461_v27 = vmul.f32 %v454_v22, %v433_v21  ;;  %1535 = vmatmul.mubr.f32.vlgmr.msra.gmra.mxu0 %v460_v24  ;;  %v957_v21 = vld [vmem:[#allocation6 + $0x268] sm:$0xff]  ;;  %v2067_v22 = vadd.f32 %v2009_v16, %v129_v15  ;;  %v956_v24 = vld [vmem:[#allocation6 + $0x260] sm:$0xff]  ;;  %v955_v16 = vld [vmem:[#allocation6 + $0x258] sm:$0xff] }
 0x118   :  { %1573 = vmatpush3.msra.mxu0 %v719_v25  ;;  %1604 = vmatprep.mubr.msk.f32.mxu0 %vm1885_vm0, %v1884_v0  ;;  %v2018_v31 = vpop.f32.mrf.mxu1  ;;  %v1077_v25 = vld [vmem:[#allocation6 + $0x2e8] sm:$0xff] }
 0x119   :  { %1574 = vmatprep.subr.mxu0 %v1884_v0  ;;  %1570 = vmatmul.mubr.f32.vlgmr.msra.gmra.mxu1 %v461_v27  ;;  %v2073_v27 = vadd.f32 %v2013_v26, %v133_v20  ;;  %v1185_v20 = vld [vmem:[#allocation6 + $0x308] sm:$0xff] }
 0x11a   :  { %1575 = vmatpush3.msra.mxu0 %v718_v28  ;;  %1608 = vmatpush3.msra.mxu1 %v839_v29  ;;  %v1501_v35 = vpop.f32.mrf.mxu1  ;;  %v1765_v59 = vpop.eup %1764  ;;  %v443_v28 = vmul.f32 0.70710677, %v2067_v22  ;;  %v1076_v29 = vld [vmem:[#allocation6 + $0x2e0] sm:$0xff] }
 0x11b   :  { %1576 = vmatprep.subr.mxu0 %v1884_v0  ;;  %1609 = vmatprep.subr.mxu1 %v1884_v0  ;;  %v455_v3 = vadd.f32 1.0, %v1765_v59  ;;  %v444_v26 = vmul.f32 0.70710677, %v2073_v27  ;;  %v952_v35 = vld [vmem:[#allocation6 + $0x240] sm:$0xff] }
 0x11c   :  { %1577 = vmatpush3.msra.mxu0 %v717_v33  ;;  %1610 = vmatpush3.msra.mxu1 %v838_v34  ;;  %v1767_v62 = vpop.eup %1766  ;;  %v953_v33 = vld [vmem:[#allocation6 + $0x248] sm:$0xff]  ;;  %1768 = verf.f32 %v443_v28  ;;  %v1074_v34 = vld [vmem:[#allocation6 + $0x2d0] sm:$0xff] }
 0x11d   :  { %1578 = vmatprep.subr.mxu0 %v1884_v0  ;;  %1611 = vmatprep.subr.mxu1 %v1884_v0  ;;  %v456_v10 = vadd.f32 1.0, %v1767_v62  ;;  %v462_v11 = vmul.f32 %v455_v3, %v434_v1  ;;  %1770 = verf.f32 %v444_v26  ;;  %v1199_v62 = vld [vmem:[#allocation6 + $0x378] sm:$0xff]  ;;  %v1198_v3 = vld [vmem:[#allocation6 + $0x370] sm:$0xff] }
 0x11e   :  { %1579 = vmatpush3.msra.mxu0 %v716_v36  ;;  %1612 = vmatpush3.msra.mxu1 %v837_v37  ;;  %v1073_v36 = vld [vmem:[#allocation6 + $0x2c8] sm:$0xff]  ;;  %v951_v37 = vld [vmem:[#allocation6 + $0x238] sm:$0xff] }
 0x11f   :  { %1580 = vmatprep.subr.mxu0 %v1884_v0  ;;  %1613 = vmatprep.subr.mxu1 %v1884_v0  ;;  %v463_v17 = vmul.f32 %v456_v10, %v435_v9  ;;  %v1192_v9 = vld [vmem:[#allocation6 + $0x340] sm:$0xff]  ;;  %v1191_v10 = vld [vmem:[#allocation6 + $0x338] sm:$0xff] }
 0x120   :  { %1581 = vmatpush3.msra.mxu0 %v715_v40  ;;  %1614 = vmatpush3.msra.mxu1 %v836_v41  ;;  %v1071_v40 = vld [vmem:[#allocation6 + $0x2b8] sm:$0xff]  ;;  %v949_v41 = vld [vmem:[#allocation6 + $0x228] sm:$0xff] }
 0x121   :  { %1582 = vmatprep.subr.mxu0 %v1884_v0  ;;  %1615 = vmatprep.subr.mxu1 %v1884_v0 }
 0x122   :  { %1583 = vmatpush3.msra.mxu0 %v714_v42  ;;  %1616 = vmatpush3.msra.mxu1 %v835_v43  ;;  %v1070_v42 = vld [vmem:[#allocation6 + $0x2b0] sm:$0xff]  ;;  %v948_v43 = vld [vmem:[#allocation6 + $0x220] sm:$0xff] }
 0x123   :  { %1584 = vmatprep.subr.mxu0 %v1884_v0  ;;  %1617 = vmatprep.subr.mxu1 %v1884_v0 }
 0x124   :  { %1585 = vmatpush3.msra.mxu0 %v713_v45  ;;  %1618 = vmatpush3.msra.mxu1 %v834_v46  ;;  %v947_v45 = vld [vmem:[#allocation6 + $0x218] sm:$0xff]  ;;  %v1068_v46 = vld [vmem:[#allocation6 + $0x2a0] sm:$0xff] }
 0x125   :  { %1586 = vmatprep.subr.mxu0 %v1884_v0  ;;  %1619 = vmatprep.subr.mxu1 %v1884_v0 }
 0x126   :  { %1587 = vmatpush3.msra.mxu0 %v712_v47  ;;  %1620 = vmatpush3.msra.mxu1 %v833_v48  ;;  %v946_v48 = vld [vmem:[#allocation6 + $0x210] sm:$0xff] }
 0x127   :  { %1588 = vmatprep.subr.mxu0 %v1884_v0  ;;  %1621 = vmatprep.subr.mxu1 %v1884_v0 }
 0x128   :  { %1589 = vmatpush3.msra.mxu0 %v711_v49  ;;  %1622 = vmatpush3.msra.mxu1 %v832_v50  ;;  %v1067_v49 = vld [vmem:[#allocation6 + $0x298] sm:$0xff]  ;;  %v945_v50 = vld [vmem:[#allocation6 + $0x208] sm:$0xff] }
 0x129   :  { %1590 = vmatprep.subr.mxu0 %v1884_v0  ;;  %1623 = vmatprep.subr.mxu1 %v1884_v0  ;;  %v1769_v47 = vpop.eup %1768 }
 0x12a   :  { %1591 = vmatpush3.msra.mxu0 %v710_v51  ;;  %1624 = vmatpush3.msra.mxu1 %v831_v52  ;;  %v1771_v51 = vpop.eup %1770  ;;  %v436_v52 = vmul.f32 0.5, %v2067_v22 }
 0x12b   :  { %1592 = vmatprep.subr.mxu0 %v1884_v0  ;;  %1625 = vmatprep.subr.mxu1 %v1884_v0  ;;  %v458_v59 = vadd.f32 1.0, %v1771_v51 }
 0x12c   :  { %1593 = vmatpush3.msra.mxu0 %v709_v53  ;;  %1626 = vmatpush3.msra.mxu1 %v830_v54  ;;  %v457_v53 = vadd.f32 1.0, %v1769_v47  ;;  %v1066_v54 = vld [vmem:[#allocation6 + $0x290] sm:$0xff] }
 0x12d   :  { %1594 = vmatprep.subr.mxu0 %v1884_v0  ;;  %1627 = vmatprep.subr.mxu1 %v1884_v0 }
 0x12e   :  { %1595 = vmatpush3.msra.mxu0 %v708_v55  ;;  %1628 = vmatpush3.msra.mxu1 %v829_v56  ;;  %v136_v55 = vsub.s32 6, %v2000_v63  ;;  %v944_v56 = vld [vmem:[#allocation6 + $0x200] sm:$0xff] }
 0x12f   :  { %1596 = vmatprep.subr.mxu0 %v1884_v0  ;;  %1629 = vmatprep.subr.mxu1 %v1884_v0 }
 0x130   :  { %1597 = vmatpush3.msra.mxu0 %v707_v57  ;;  %1630 = vmatpush3.msra.mxu1 %v828_v58  ;;  %v1065_v57 = vld [vmem:[#allocation6 + $0x288] sm:$0xff]  ;;  %v437_v58 = vmul.f32 0.5, %v2073_v27  ;;  %v137_v63 = vrot.slane %v2003_v2, %v136_v55 }
 0x131   :  { %1598 = vmatprep.subr.mxu0 %v1884_v0  ;;  %1631 = vmatprep.subr.mxu1 %v1884_v0  ;;  %v1197_v2 = vld [vmem:[#allocation6 + $0x368] sm:$0xff] }
 0x132   :  { %1599 = vmatpush3.msra.mxu0 %v706_v60  ;;  %1632 = vmatpush3.msra.mxu1 %v827_v61  ;;  %v464_v60 = vmul.f32 %v457_v53, %v436_v52  ;;  %v1064_v61 = vld [vmem:[#allocation6 + $0x280] sm:$0xff]  ;;  %v465_v1 = vmul.f32 %v458_v59, %v437_v58  ;;  %v1358_v58 = vld [vmem:[%s2181_s4 + $0x5] ss:$0 sm:$0xff] }
 0x133   :  { %1600 = vmatprep.subr.mxu0 %v1884_v0  ;;  %1633 = vmatprep.subr.mxu1 %v1884_v0 }
 0x134   :  { %1601 = vmatpush3.msra.mxu0 %v705_v4  ;;  %1634 = vmatpush3.msra.mxu1 %v826_v5  ;;  %v429_v4 = vadd.f32 %v2018_v31, %v137_v63  ;;  %v1196_v5 = vld [vmem:[#allocation6 + $0x360] sm:$0xff]  ;;  %v1194_v31 = vld [vmem:[#allocation6 + $0x350] sm:$0xff] }
 0x135   :  { %1602 = vmatprep.subr.mxu0 %v1884_v0  ;;  %1635 = vmatprep.subr.mxu1 %v1884_v0 }
 0x136   :  { %1603 = vmatpush3.msra.mxu0 %v704_v7  ;;  %1636 = vmatpush3.msra.mxu1 %v825_v8  ;;  %v445_v6 = vmul.f32 0.70710677, %v429_v4  ;;  %v1195_v7 = vld [vmem:[#allocation6 + $0x358] sm:$0xff]  ;;  %v1193_v8 = vld [vmem:[#allocation6 + $0x348] sm:$0xff] }
 0x137   :  { %1605 = vmatmul.mubr.f32.vlgmr.msra.gmra.mxu0 %v462_v11  ;;  %1637 = vmatprep.subr.mxu1 %v1884_v0  ;;  %v1190_v11 = vld [vmem:[#allocation6 + $0x330] sm:$0xff] }
 0x138   :  { %1642 = vmatprep.subr.mxu0 %v1884_v0  ;;  %1638 = vmatpush3.msra.mxu1 %v824_v12  ;;  %1772 = verf.f32 %v445_v6  ;;  %v1189_v12 = vld [vmem:[#allocation6 + $0x328] sm:$0xff]  ;;  %v1343_v6 = vld [vmem:[%s2181_s4 + $0x2] ss:$0 sm:$0xff] }
 0x139   :  { %1639 = vmatprep.mubr.msk.f32.mxu1 %vm1885_vm0, %v1884_v0  ;;  %1643 = vmatpush3.msra.mxu0 %v959_v14  ;;  %v1187_v14 = vld [vmem:[#allocation6 + $0x318] sm:$0xff] }
 0x13a   :  { %1640 = vmatmul.mubr.f32.vlgmr.msra.gmra.mxu1 %v463_v17  ;;  %1644 = vmatprep.subr.mxu0 %v1884_v0  ;;  %v1186_v17 = vld [vmem:[#allocation6 + $0x310] sm:$0xff] }
 0x13b   :  { %1677 = vmatprep.subr.mxu1 %v1884_v0  ;;  %1645 = vmatpush3.msra.mxu0 %v958_v18  ;;  %v438_v18 = vmul.f32 0.5, %v429_v4 }
 0x13c   :  { %1678 = vmatpush3.msra.mxu1 %v1079_v19  ;;  %1646 = vmatprep.subr.mxu0 %v1884_v0 }
 0x13d   :  { %1679 = vmatprep.subr.mxu1 %v1884_v0  ;;  %1647 = vmatpush3.msra.mxu0 %v957_v21  ;;  %v1184_v21 = vld [vmem:[#allocation6 + $0x300] sm:$0xff] }
 0x13e   :  { %1680 = vmatpush3.msra.mxu1 %v1078_v23  ;;  %1648 = vmatprep.subr.mxu0 %v1884_v0  ;;  %v1334_v23 = vld [vmem:[%s2181_s4] ss:$0 sm:$0xff] }
 0x13f   :  { %1681 = vmatprep.subr.mxu1 %v1884_v0  ;;  %1649 = vmatpush3.msra.mxu0 %v956_v24 }
 0x140   :  { %1682 = vmatpush3.msra.mxu1 %v1077_v25  ;;  %1650 = vmatprep.subr.mxu0 %v1884_v0  ;;  %v1338_v25 = vld [vmem:[%s2181_s4 + $0x1] ss:$0 sm:$0xff] }
 0x141   :  { %1683 = vmatprep.subr.mxu1 %v1884_v0  ;;  %1651 = vmatpush3.msra.mxu0 %v955_v16 }
 0x142   :  { %1684 = vmatpush3.msra.mxu1 %v1076_v29  ;;  %1652 = vmatprep.subr.mxu0 %v1884_v0 }
 0x143   :  { %1685 = vmatprep.subr.mxu1 %v1884_v0  ;;  %1653 = vmatpush3.msra.mxu0 %v954_v30 }
 0x144   :  { %1686 = vmatpush3.msra.mxu1 %v1075_v32  ;;  %1654 = vmatprep.subr.mxu0 %v1884_v0 }
 0x145   :  { %1687 = vmatprep.subr.mxu1 %v1884_v0  ;;  %1655 = vmatpush3.msra.mxu0 %v953_v33  ;;  %v1773_v15 = vpop.eup %1772 }
 0x146   :  { %1688 = vmatpush3.msra.mxu1 %v1074_v34  ;;  %1656 = vmatprep.subr.mxu0 %v1884_v0  ;;  %v459_v19 = vadd.f32 1.0, %v1773_v15 }
 0x147   :  { %1689 = vmatprep.subr.mxu1 %v1884_v0  ;;  %1657 = vmatpush3.msra.mxu0 %v952_v35 }
 0x148   :  { %1690 = vmatpush3.msra.mxu1 %v1073_v36  ;;  %1658 = vmatprep.subr.mxu0 %v1884_v0  ;;  %v466_v22 = vmul.f32 %v459_v19, %v438_v18  ;;  %v1335_v36 = vld [vmem:[#allocation7] ss:$0 sm:$0xff] }
 0x149   :  { %1691 = vmatprep.subr.mxu1 %v1884_v0  ;;  %1659 = vmatpush3.msra.mxu0 %v951_v37 }
 0x14a   :  { %1692 = vmatpush3.msra.mxu1 %v1072_v38  ;;  %1660 = vmatprep.subr.mxu0 %v1884_v0 }
 0x14b   :  { %1693 = vmatprep.subr.mxu1 %v1884_v0  ;;  %1661 = vmatpush3.msra.mxu0 %v950_v39 }
 0x14c   :  { %1694 = vmatpush3.msra.mxu1 %v1071_v40  ;;  %1662 = vmatprep.subr.mxu0 %v1884_v0 }
 0x14d   :  { %1695 = vmatprep.subr.mxu1 %v1884_v0  ;;  %1663 = vmatpush3.msra.mxu0 %v949_v41 }
 0x14e   :  { %1696 = vmatpush3.msra.mxu1 %v1070_v42  ;;  %1664 = vmatprep.subr.mxu0 %v1884_v0  ;;  %v1339_v42 = vld [vmem:[#allocation7 + $0x1] ss:$0 sm:$0xff] }
 0x14f   :  { %1697 = vmatprep.subr.mxu1 %v1884_v0  ;;  %1665 = vmatpush3.msra.mxu0 %v948_v43 }
 0x150   :  { %1698 = vmatpush3.msra.mxu1 %v1069_v44  ;;  %1666 = vmatprep.subr.mxu0 %v1884_v0 }
 0x151   :  { %1699 = vmatprep.subr.mxu1 %v1884_v0  ;;  %1667 = vmatpush3.msra.mxu0 %v947_v45  ;;  %v1348_v45 = vld [vmem:[%s2181_s4 + $0x3] ss:$0 sm:$0xff] }
 0x152   :  { %1700 = vmatpush3.msra.mxu1 %v1068_v46  ;;  %1668 = vmatprep.subr.mxu0 %v1884_v0 }
 0x153   :  { %1701 = vmatprep.subr.mxu1 %v1884_v0  ;;  %1669 = vmatpush3.msra.mxu0 %v946_v48 }
 0x154   :  { %1702 = vmatpush3.msra.mxu1 %v1067_v49  ;;  %1670 = vmatprep.subr.mxu0 %v1884_v0 }
 0x155   :  { %1703 = vmatprep.subr.mxu1 %v1884_v0  ;;  %1671 = vmatpush3.msra.mxu0 %v945_v50 }
 0x156   :  { %1704 = vmatpush3.msra.mxu1 %v1066_v54  ;;  %1672 = vmatprep.subr.mxu0 %v1884_v0  ;;  %v1349_v54 = vld [vmem:[#allocation7 + $0x3] ss:$0 sm:$0xff] }
 0x157   :  { %1705 = vmatprep.subr.mxu1 %v1884_v0  ;;  %1673 = vmatpush3.msra.mxu0 %v944_v56 }
 0x158   :  { %1674 = vmatprep.mubr.msk.f32.mxu0 %vm1885_vm0, %v1884_v0  ;;  %1706 = vmatpush3.msra.mxu1 %v1065_v57 }
 0x159   :  { %1675 = vmatmul.mubr.f32.vlgmr.msra.gmra.mxu0 %v464_v60  ;;  %1707 = vmatprep.subr.mxu1 %v1884_v0 }
 0x15a   :  { %1712 = vmatprep.subr.mxu0 %v1884_v0  ;;  %1708 = vmatpush3.msra.mxu1 %v1064_v61 }
 0x15b   :  { %1709 = vmatprep.mubr.msk.f32.mxu1 %vm1885_vm0, %v1884_v0  ;;  %1713 = vmatpush3.msra.mxu0 %v1199_v62 }
 0x15c   :  { %1710 = vmatmul.mubr.f32.vlgmr.msra.gmra.mxu1 %v465_v1  ;;  %1714 = vmatprep.subr.mxu0 %v1884_v0 }
 0x15d   :  { %1715 = vmatpush3.msra.mxu0 %v1198_v3  ;;  %1744 = vmatprep.mubr.msk.f32.mxu0 %vm1885_vm0, %v1884_v0 }
 0x15e   :  { %1716 = vmatprep.subr.mxu0 %v1884_v0 }
 0x15f   :  { %1717 = vmatpush3.msra.mxu0 %v1197_v2  ;;  %v1359_v2 = vld [vmem:[#allocation7 + $0x5] ss:$0 sm:$0xff] }
 0x160   :  { %1718 = vmatprep.subr.mxu0 %v1884_v0 }
 0x161   :  { %1719 = vmatpush3.msra.mxu0 %v1196_v5 }
 0x162   :  { %1720 = vmatprep.subr.mxu0 %v1884_v0 }
 0x163   :  { %1721 = vmatpush3.msra.mxu0 %v1195_v7 }
 0x164   :  { %1722 = vmatprep.subr.mxu0 %v1884_v0 }
 0x165   :  { %1723 = vmatpush3.msra.mxu0 %v1194_v31 }
 0x166   :  { %1724 = vmatprep.subr.mxu0 %v1884_v0 }
 0x167   :  { %1725 = vmatpush3.msra.mxu0 %v1193_v8  ;;  %v1353_v8 = vld [vmem:[%s2181_s4 + $0x4] ss:$0 sm:$0xff] }
 0x168   :  { %1726 = vmatprep.subr.mxu0 %v1884_v0 }
 0x169   :  { %1727 = vmatpush3.msra.mxu0 %v1192_v9  ;;  %v1363_v9 = vld [vmem:[%s2181_s4 + $0x6] ss:$0 sm:$0xff] }
 0x16a   :  { %1728 = vmatprep.subr.mxu0 %v1884_v0 }
 0x16b   :  { %1729 = vmatpush3.msra.mxu0 %v1191_v10 }
 0x16c   :  { %1730 = vmatprep.subr.mxu0 %v1884_v0 }
 0x16d   :  { %1731 = vmatpush3.msra.mxu0 %v1190_v11 }
 0x16e   :  { %1732 = vmatprep.subr.mxu0 %v1884_v0 }
 0x16f   :  { %1733 = vmatpush3.msra.mxu0 %v1189_v12 }
 0x170   :  { %1734 = vmatprep.subr.mxu0 %v1884_v0 }
 0x171   :  { %1735 = vmatpush3.msra.mxu0 %v1188_v13 }
 0x172   :  { %1736 = vmatprep.subr.mxu0 %v1884_v0 }
 0x173   :  { %1737 = vmatpush3.msra.mxu0 %v1187_v14 }
 0x174   :  { %1738 = vmatprep.subr.mxu0 %v1884_v0 }
 0x175   :  { %1739 = vmatpush3.msra.mxu0 %v1186_v17 }
 0x176   :  { %1740 = vmatprep.subr.mxu0 %v1884_v0 }
 0x177   :  { %1741 = vmatpush3.msra.mxu0 %v1185_v20 }
 0x178   :  { %1742 = vmatprep.subr.mxu0 %v1884_v0 }
 0x179   :  { %1743 = vmatpush3.msra.mxu0 %v1184_v21 }
 0x17a   :  { %1745 = vmatmul.mubr.f32.vlgmr.msra.gmra.mxu0 %v466_v22 }
 0x1d7   :  { %v556_v24 = vpop.f32.mrf.mxu0 }
 0x1d8   :  { %v557_v27 = vadd.f32 %v1334_v23, %v556_v24  ;;  %v1364_v24 = vld [vmem:[#allocation7 + $0x6] ss:$0 sm:$0xff] }
 0x1d9   :  { %v1536_v16 = vpop.f32.mrf.mxu0  ;;  %v674_v28 = vpop.f32.mrf.mxu1 }
 0x1da   :  { %v561_v29 = vmul.f32 0.70710677, %v557_v27  ;;  %v675_v30 = vadd.f32 %v1338_v25, %v674_v28  ;;  %v560_v33 = vmul.f32 0.5, %v557_v27 }
 0x1db   :  { %v1571_v32 = vpop.f32.mrf.mxu1 }
 0x1dc   :  { %1774 = verf.f32 %v561_v29  ;;  %v679_v26 = vmul.f32 0.70710677, %v675_v30  ;;  %v678_v37 = vmul.f32 0.5, %v675_v30  ;;  %v1344_v30 = vld [vmem:[#allocation7 + $0x2] ss:$0 sm:$0xff] }
 0x1de   :  { %1776 = verf.f32 %v679_v26 }
 0x1e9   :  { %v1775_v0 = vpop.eup %1774 }
 0x1ea   :  { %v563_v34 = vadd.f32 1.0, %v1775_v0 }
 0x1eb   :  { %v1777_v35 = vpop.eup %1776 }
 0x1ec   :  { %v564_v38 = vmul.f32 %v563_v34, %v560_v33  ;;  %v681_v39 = vadd.f32 1.0, %v1777_v35  ;;  %v1354_v33 = vld [vmem:[#allocation7 + $0x4] ss:$0 sm:$0xff]  ;;  %v1361_v35 = vld [vmem:[%s2183_s6 + $0x5] ss:$0 sm:$0xff] }
 0x1ee   :  { %v572_v40 = vmul.f32 %v1335_v36, %v564_v38  ;;  %v682_v41 = vmul.f32 %v681_v39, %v678_v37  ;;  %v1366_v38 = vld [vmem:[%s2183_s6 + $0x6] ss:$0 sm:$0xff] }
 0x1f0   :  { %573 = vadd.xlane.f32.xlu1 %v572_v40  ;;  %v691_v43 = vmul.f32 %v1339_v42, %v682_v41  ;;  %v1341_v42 = vld [vmem:[%s2183_s6 + $0x1] ss:$0 sm:$0xff] }
 0x1f4   :  { %692 = vadd.xlane.f32.xlu1 %v691_v43 }
 0x1f7   :  { %v794_v44 = vpop.f32.mrf.mxu0 }
 0x1f8   :  { %v795_v31 = vadd.f32 %v1343_v6, %v794_v44  ;;  %v1336_v44 = vld [vmem:[%s2183_s6] ss:$0 sm:$0xff] }
 0x1f9   :  { %v1606_v46 = vpop.f32.mrf.mxu0 }
 0x1fa   :  { %v914_v47 = vpop.f32.mrf.mxu1  ;;  %v799_v10 = vmul.f32 0.70710677, %v795_v31  ;;  %v798_v25 = vmul.f32 0.5, %v795_v31 }
 0x1fb   :  { %v915_v48 = vadd.f32 %v1348_v45, %v914_v47  ;;  %v1346_v45 = vld [vmem:[%s2183_s6 + $0x2] ss:$0 sm:$0xff] }
 0x1fc   :  { %v1641_v49 = vpop.f32.mrf.mxu1 }
 0x1fd   :  { %v919_v50 = vmul.f32 0.70710677, %v915_v48  ;;  %v918_v52 = vmul.f32 0.5, %v915_v48 }
 0x1ff   :  { %1778 = verf.f32 %v919_v50 }
 0x20c   :  { %v1779_v51 = vpop.eup %1778 }
 0x20d   :  { %v921_v53 = vadd.f32 1.0, %v1779_v51  ;;  %v1351_v51 = vld [vmem:[%s2183_s6 + $0x3] ss:$0 sm:$0xff] }
 0x20f   :  { %v922_v55 = vmul.f32 %v921_v53, %v918_v52 }
 0x211   :  { %v931_v56 = vmul.f32 %v1349_v54, %v922_v55  ;;  %v1356_v54 = vld [vmem:[%s2183_s6 + $0x4] ss:$0 sm:$0xff] }
 0x213   :  { %932 = vadd.xlane.f32.xlu1 %v931_v56 }
 0x219   :  { %v1034_v57 = vpop.f32.mrf.mxu0 }
 0x21a   :  { %v1035_v11 = vadd.f32 %v1353_v8, %v1034_v57 }
 0x21b   :  { %v1676_v59 = vpop.f32.mrf.mxu0 }
 0x21c   :  { %v1154_v60 = vpop.f32.mrf.mxu1  ;;  %v1039_v15 = vmul.f32 0.70710677, %v1035_v11  ;;  %v1038_v32 = vmul.f32 0.5, %v1035_v11 }
 0x21d   :  { %v1155_v61 = vadd.f32 %v1358_v58, %v1154_v60 }
 0x21e   :  { %v1711_v63 = vpop.f32.mrf.mxu1 }
 0x21f   :  { %v1159_v62 = vmul.f32 0.70710677, %v1155_v61  ;;  %v1158_v3 = vmul.f32 0.5, %v1155_v61 }
 0x221   :  { %1780 = verf.f32 %v1159_v62 }
 0x222   :  { %1782 = verf.f32 %v799_v10 }
 0x22e   :  { %v1781_v1 = vpop.eup %1780 }
 0x22f   :  { %v1161_v4 = vadd.f32 1.0, %v1781_v1  ;;  %v1783_v18 = vpop.eup %1782 }
 0x230   :  { %v801_v22 = vadd.f32 1.0, %v1783_v18 }
 0x231   :  { %v1162_v5 = vmul.f32 %v1161_v4, %v1158_v3 }
 0x232   :  { %v802_v28 = vmul.f32 %v801_v22, %v798_v25 }
 0x233   :  { %v1171_v7 = vmul.f32 %v1359_v2, %v1162_v5 }
 0x234   :  { %v811_v26 = vmul.f32 %v1344_v30, %v802_v28 }
 0x235   :  { %1172 = vadd.xlane.f32.xlu0 %v1171_v7 }
 0x23a   :  { %v1274_v12 = vpop.f32.mrf.mxu0 }
 0x23b   :  { %v1275_v13 = vadd.f32 %v1363_v9, %v1274_v12 }
 0x23c   :  { %v1746_v14 = vpop.f32.mrf.mxu0 }
 0x23d   :  { %v1279_v17 = vmul.f32 0.70710677, %v1275_v13  ;;  %v1278_v20 = vmul.f32 0.5, %v1275_v13 }
 0x23f   :  { %1784 = verf.f32 %v1279_v17 }
 0x240   :  { %1786 = verf.f32 %v1039_v15 }
 0x24c   :  { %v1785_v19 = vpop.eup %1784 }
 0x24d   :  { %v1281_v21 = vadd.f32 1.0, %v1785_v19  ;;  %v1787_v23 = vpop.eup %1786 }
 0x24e   :  { %v1041_v29 = vadd.f32 1.0, %v1787_v23 }
 0x24f   :  { %v1282_v27 = vmul.f32 %v1281_v21, %v1278_v20 }
 0x250   :  { %v1042_v0 = vmul.f32 %v1041_v29, %v1038_v32 }
 0x251   :  { %v1291_v16 = vmul.f32 %v1364_v24, %v1282_v27 }
 0x252   :  { %v1051_v34 = vmul.f32 %v1354_v33, %v1042_v0 }
 0x253   :  { %1292 = vadd.xlane.f32.xlu0 %v1291_v16 }
 0x257   :  { %812 = vadd.xlane.f32.xlu0 %v811_v26 }
 0x25b   :  { %1052 = vadd.xlane.f32.xlu0 %v1051_v34 }
 0x279   :  { %v574_v41 = vpop.xlane.xlu1 %573 }
 0x27a   :  { %v582_v48 = vadd.f32 %v1336_v44, %v574_v41 }
 0x27d   :  { %v693_v43 = vpop.xlane.xlu1 %692 }
 0x27e   :  { %v702_v47 = vadd.f32 %v1341_v42, %v693_v43 }
 0x280   :  { %v1304_v50 = vadd.f32 %v702_v47, %v582_v48 }
 0x29c   :  { %v933_v52 = vpop.xlane.xlu1 %932 }
 0x29d   :  { %v942_v56 = vadd.f32 %v1351_v51, %v933_v52 }
 0x2be   :  { %v1173_v36 = vpop.xlane.xlu0 %1172 }
 0x2bf   :  { %v1182_v37 = vadd.f32 %v1361_v35, %v1173_v36 }
 0x2c1   :  { %1310 = vrot.lane.b32.xlu1 %v1182_v37, %s1883_s24 }
 0x2dc   :  { %v1293_v39 = vpop.xlane.xlu0 %1292 }
 0x2dd   :  { %v1302_v40 = vadd.f32 %v1366_v38, %v1293_v39 }
 0x2df   :  { %1314 = vrot.lane.b32.xlu0 %v1302_v40, %s1886_s19 }
 0x2e0   :  { %v813_v46 = vpop.xlane.xlu0 %812 }
 0x2e1   :  { %v822_v49 = vadd.f32 %v1346_v45, %v813_v46 }
 0x2e3   :  { %v1305_v53 = vadd.f32 %v1304_v50, %v822_v49 }
 0x2e4   :  { %v1053_v55 = vpop.xlane.xlu0 %1052 }
 0x2e5   :  { %v1306_v57 = vadd.f32 %v1305_v53, %v942_v56  ;;  %v1062_v58 = vadd.f32 %v1356_v54, %v1053_v55 }
 0x2e7   :  { %v1307_v59 = vadd.f32 %v1306_v57, %v1062_v58 }
 0x2e9   :  { %v1308_v61 = vmul.f32 0.2, %v1307_v59 }
 0x333   :  { %v1311_v60 = vpop.permute.xlu1 %1310 }
 0x334   :  { %v1318_v63 = vsel %vm1317_vm2, %v1308_v61, %v1311_v60 }
 0x351   :  { %v1315_v62 = vpop.permute.xlu0 %1314 }
 0x352   :  { %v1320_v1 = vsel %vm1319_vm3, %v1318_v63, %v1315_v62 }
 0x353   :  { %1322 = vst.msk [vmem:[%s2184_s7] sm:$0xff] %vm1321_vm4, %v1320_v1 }
 0x354   :  { %1327 = vsyncpa [#allocation3], 1 }
 0x355   :  { %1328 = vsyncpa [#allocation5], 1 }
 0x356   :  { %1329 = vsyncpa [#allocation8], 1 }

</bundles_post_ra>
